<compile_context>
chip_gen: v6e
topology: v6e:2x2x1
jax: 0.10.0
libtpu: 0.0.40
codegen_flags: <defaults>
</compile_context>

<pallas_src>
import jax
import jax.numpy as jnp
from jax.experimental import pallas as pl
from jax.experimental.pallas import tpu as pltpu


def _relu_conv1x1_kernel(x_ref, w_ref, o_ref):
    # x_ref: (Cin, HW)   full-spatial activation slab (batch dim squeezed)
    # w_ref: (Ct,  Cin)  weight tile for this Cout block
    # o_ref: (Ct,  HW)   output tile (lane-dense: minor dim = full HW)
    x = jnp.maximum(x_ref[...], 0.0)                       # fused ReLU (VPU)
    o_ref[...] = jnp.dot(                                  # MXU, f32 accumulation
        w_ref[...], x, preferred_element_type=jnp.float32
    ).astype(o_ref.dtype)


def relu_conv1x1(x_nchw, w_oihw, *, cout_tile=64, out_dtype=None):
    """Fused ReLU + 1x1 conv (no bias), NCHW in / NCHW out.

    x_nchw: (N, Cin, H, W)
    w_oihw: (Cout, Cin, 1, 1)
    cout_tile: output-channel rows handled per grid step.  64 gives 4 parallel
        steps at Cout=256 (v7x megacore sharding + pipelined writeback) while
        keeping every output store at the full H*W lane width.
    out_dtype: output dtype (defaults to x dtype; pass jnp.bfloat16 to cut the
        dominant HBM writeback traffic ~40% if reduced precision is OK).
    """
    N, Cin, H, W = x_nchw.shape
    Cout = w_oihw.shape[0]
    HW = H * W
    out_dtype = x_nchw.dtype if out_dtype is None else out_dtype

    # Free reshapes (no data movement): NCHW -> (N, Cin, HW), OIHW -> (Cout, Cin).
    x_3d = x_nchw.reshape(N, Cin, HW)
    w_2d = w_oihw.reshape(Cout, Cin)

    # Pick a Cout tile that divides Cout and is sublane-friendly (multiple of 8);
    # otherwise fall back to a single full-extent Cout block.
    ct = min(cout_tile, Cout)
    if Cout % ct != 0 or (ct % 8 != 0 and ct != Cout):
        ct = Cout

    grid = (N, Cout // ct)

    out_itemsize = jnp.dtype(out_dtype).itemsize
    cost = pl.CostEstimate(
        flops=2 * N * HW * Cin * Cout,
        transcendentals=0,
        bytes_accessed=4 * (N * Cin * HW + Cin * Cout)
        + out_itemsize * N * Cout * HW,
    )

    out = pl.pallas_call(
        _relu_conv1x1_kernel,
        out_shape=jax.ShapeDtypeStruct((N, Cout, HW), out_dtype),
        grid_spec=pltpu.PrefetchScalarGridSpec(
            num_scalar_prefetch=0,
            grid=grid,
            in_specs=[
                # Activation: full-extent (Cin, HW) slab; block index constant
                # across the Cout axis, so it is not re-DMA'd between Cout steps.
                pl.BlockSpec((pl.Squeezed(), Cin, HW), lambda n, c: (n, 0, 0)),
                # Weight tile for this Cout block.
                pl.BlockSpec((ct, Cin), lambda n, c: (c, 0)),
            ],
            out_specs=pl.BlockSpec((pl.Squeezed(), ct, HW), lambda n, c: (n, c, 0)),
        ),
        compiler_params=pltpu.CompilerParams(
            dimension_semantics=("parallel", "parallel"),
        ),
        cost_estimate=cost,
    )(x_3d, w_2d)

    return out.reshape(N, Cout, H, W)            # free reshape back to NCHW


if __name__ == "__main__":
    key = jax.random.PRNGKey(0)
    kx, kw = jax.random.split(key)

    # Shapes from the PyTorch module: x23 = (1, 64, 56, 56), Conv2d(64, 256, 1x1, bias=False).
    N, Cin, H, W, Cout = 1, 64, 56, 56, 256
    x = jax.random.normal(kx, (N, Cin, H, W), dtype=jnp.float32)
    w = jax.random.normal(kw, (Cout, Cin, 1, 1), dtype=jnp.float32) * 0.05

    # Reference: ReLU + 1x1 conv as an einsum in plain JAX (f32).
    ref = jnp.einsum("nchw,oc->nohw", jnp.maximum(x, 0.0), w.reshape(Cout, Cin))

    # Exact f32 path (matches the PyTorch module semantics).
    y = jax.block_until_ready(relu_conv1x1(x, w))
    assert y.shape == (N, Cout, H, W)
    assert jnp.allclose(y, ref, atol=1e-4, rtol=1e-4), float(jnp.max(jnp.abs(y - ref)))

    print("KERNEL_OK")
</pallas_src>

<mosaic_0001>
module attributes {stable_mosaic.version = 11 : i64} {
  func.func @_relu_conv1x1_kernel(%arg0: i32, %arg1: i32, %arg2: memref<1x64x3136xf32, #tpu.memory_space<vmem>>, %arg3: memref<64x64xf32, #tpu.memory_space<vmem>>, %arg4: memref<1x64x3136xf32, #tpu.memory_space<vmem>>) attributes {dimension_semantics = [#tpu.dimension_semantics<parallel>, #tpu.dimension_semantics<parallel>], iteration_bounds = array<i64: 1, 4>, scalar_prefetch = 0 : i64, scratch_operands = 0 : i64, tpu.core_type = #tpu.core_type<tc>, window_params = [{transform_indices = @transform_0, window_bounds = array<i64: 1, 64, 3136>}, {transform_indices = @transform_1, window_bounds = array<i64: 64, 64>}, {transform_indices = @transform_2, window_bounds = array<i64: 1, 64, 3136>}]} {
    %c0 = arith.constant 0 : index
    %c0_0 = arith.constant 0 : index
    %c0_1 = arith.constant 0 : index
    %0 = vector.load %arg2[%c0, %c0_0, %c0_1] : memref<1x64x3136xf32, #tpu.memory_space<vmem>>, vector<1x64x3136xf32>
    %1 = vector.shape_cast %0 : vector<1x64x3136xf32> to vector<64x3136xf32>
    %cst = arith.constant 0.000000e+00 : f32
    %2 = vector.broadcast %cst : f32 to vector<64x3136xf32>
    %3 = arith.maximumf %1, %2 : vector<64x3136xf32>
    %c0_2 = arith.constant 0 : index
    %c0_3 = arith.constant 0 : index
    %4 = vector.load %arg3[%c0_2, %c0_3] : memref<64x64xf32, #tpu.memory_space<vmem>>, vector<64x64xf32>
    %cst_4 = arith.constant dense<0.000000e+00> : vector<64x3136xf32>
    %5 = tpu.matmul %4, %3, %cst_4 {dimension_numbers = #tpu.dot_dimension_numbers<[1], [0], [0], [1], [0, 0, 1, 1], [], []>} : vector<64x64xf32>, vector<64x3136xf32>, vector<64x3136xf32> -> vector<64x3136xf32>
    %c0_5 = arith.constant 0 : index
    %c0_6 = arith.constant 0 : index
    %c0_7 = arith.constant 0 : index
    %6 = vector.load %arg4[%c0_5, %c0_6, %c0_7] : memref<1x64x3136xf32, #tpu.memory_space<vmem>>, vector<1x64x3136xf32>
    %7 = vector.shape_cast %6 : vector<1x64x3136xf32> to vector<64x3136xf32>
    %8 = vector.shape_cast %5 : vector<64x3136xf32> to vector<1x64x3136xf32>
    tpu.vector_store %arg4[%c0_5, %c0_6, %c0_7], %8 {strides = array<i32>} : memref<1x64x3136xf32, #tpu.memory_space<vmem>>, vector<1x64x3136xf32>,
    return
  }
  func.func @transform_0(%arg0: i32, %arg1: i32) -> (i32, i32, i32) {
    %c0_i32 = arith.constant 0 : i32
    %c0_i32_0 = arith.constant 0 : i32
    %c0_i32_1 = arith.constant 0 : i32
    return %arg0, %c0_i32, %c0_i32_0 : i32, i32, i32
  }
  func.func @transform_1(%arg0: i32, %arg1: i32) -> (i32, i32) {
    %c0_i32 = arith.constant 0 : i32
    %c0_i32_0 = arith.constant 0 : i32
    return %arg1, %c0_i32 : i32, i32
  }
  func.func @transform_2(%arg0: i32, %arg1: i32) -> (i32, i32, i32) {
    %c0_i32 = arith.constant 0 : i32
    %c0_i32_0 = arith.constant 0 : i32
    return %arg0, %arg1, %c0_i32 : i32, i32, i32
  }
}

</mosaic_0001>

<bundles_post_ra>
// kernel: tpu_custom_call.1
= control target key start
LH: loop header
LB: loop body
LE: loop exit
PB: predicated region body
PF: predicated region fallthrough
CT: control target
= control target key end

     0   :  { %7 = vsyncpa [#allocation3], 0  ;;  %s2686_s9 = smov 0   ;;  %s2688_s10 = smov 0   ;;  %s3322_s0 = inlined_call_operand.hbm [shape: f32[1,64,3136], index: 0, kind: input, shape index: {}]   ;;  %s3323_s1 = inlined_call_operand.vmem [shape: f32[256,64], index: 1, kind: input, shape index: {}]   ;;  %s3324_s2 = inlined_call_operand.vmem [shape: f32[1,256,3136], index: 2, kind: output, shape index: {}]  }
   0x1   :  { %s2690_s11 = smov 0  }
   0x2 LB: > { %s2389_s12 = sadd.s32 4294967295, %s2665_s11   ;;  %s22_s13 = sadd.s32 1, %s2661_s10  ;;  %s2665_s11 = sphi %s2690_s11, %s13_s11   ;;  %s2661_s10 = sphi %s2688_s10, %s3329_s10   ;;  %s2657_s9 = sphi %s2686_s9, %s3328_s9  }
   0x3   : > { %p23_p0 = scmp.ge.s32.totalorder %s22_s13, 4  ;;  %p2391_p1 = scmp.ge.s32.totalorder %s2665_s11, 1 }
   0x4   : > { %p110_p2 = scmp.lt.s32.totalorder %s2665_s11, 5  ;;  %p2711_p4 = scmp.eq.s32.totalorder %s2389_s12, 0 }
   0x5   : > { %s3331_s13 = smov (%p23_p0, %s22_s13), 0  ;;  %s2667_s16 = smov [#allocation2]  }
   0x6   : > { %p2707_p3 = pnand %p2391_p1, %p110_p2  ;;  %s125_s17 = sshll.u32 %s2667_s16, 4  ;;  %s126_s17 = int_to_ptr.vmem [resolvable:$true] %s125_s17 }
   0x7   : > { %s2624_s18 = scalar_lea.vmem %s126_s17, 25600  ;;  %p2632_p11 = scmp.lt.s32.totalorder %s126_s17, %s126_s17 }
   0x8   : > { %p2571_p5 = pneg %p2707_p3  ;;  %p2625_p8 = scmp.ne.s32.totalorder %s126_s17, %s2624_s18 }
   0x9   : > { %p2633_p12 = scmp.lt.s32.totalorder %s2624_s18, %s2624_s18 }
   0xa   : > { %p2572_p6 = pnand %p2711_p4, %p2571_p5 }
   0xb   : > { %p2634_p13 = por %p2633_p12, %p2632_p11 }
   0xc   : > { %p2615_p7 = pneg %p2572_p6 }
   0xe   : > { %p2627_p9 = pnand %p2625_p8, %p2615_p7 }
  0x10   : > { %p2628_p10 = pneg %p2627_p9 }
  0x12   : > { %p2635_p0 = pnand %p2634_p13, %p2628_p10 }
  0x14   : > { %2638 = shalt.err (!%p2635_p0)
}
  0x15   : > { %s2668_s19 = smov 3200   ;;  %s2669_s20 = smov 200  }
  0x16   : > { %2574 = dma.hbm_to_vmem [thread:$0]  (!%p2572_p6), %s3322_s0, 25600, %s126_s17, [#allocation3], %s2668_s19, %s2668_s19, %s2669_s20  }
  0x17   : > { %150 = sbr.rel (%p2707_p3) target bundleno = 440 (0x1b8), region = 28 }
  0x1c   : > { %2652 = dma.done.wait (%p2711_p4), [#allocation3], 25600  }
  0x1d   : > { %2654 = vsyncadd (%p2711_p4), [#allocation3], 4294941696  ;;  %v2670_v0 = vmov 0.0   ;;  %s2396_s23 = sshll.u32 %s2657_s9, 3  ;;  %v370_v1 = vld [vmem:[#allocation2 + $0x580] sm:$0xff]  ;;  %v372_v2 = vld [vmem:[#allocation2 + $0x590] sm:$0xff] }
  0x1e   : > { %691 = vmatprep.mubr.f32.mxu0 %v2670_v0  ;;  %804 = vmatprep.mubr.f32.mxu1 %v2670_v0  ;;  %v369_v3 = vld [vmem:[#allocation2 + $0x578] sm:$0xff]  ;;  %p2733_p1 = scmp.lt.s32.totalorder %s2396_s23, 31  ;;  %v570_v4 = vmax.f32 %v370_v1, 0.0  ;;  %v572_v5 = vmax.f32 %v372_v2, 0.0  ;;  %v371_v7 = vld [vmem:[#allocation2 + $0x588] sm:$0xff]  ;;  %v344_v13 = vld [vmem:[#allocation2 + $0x4b0] sm:$0xff] }
  0x1f   : > { %v569_v6 = vmax.f32 %v369_v3, 0.0  ;;  %v345_v8 = vld [vmem:[#allocation2 + $0x4b8] sm:$0xff]  ;;  %v347_v9 = vld [vmem:[#allocation2 + $0x4c8] sm:$0xff]  ;;  %v571_v10 = vmax.f32 %v371_v7, 0.0  ;;  %v346_v14 = vld [vmem:[#allocation2 + $0x4c0] sm:$0xff]  ;;  %v544_v16 = vmax.f32 %v344_v13, 0.0 }
  0x20   : > { %v545_v11 = vmax.f32 %v345_v8, 0.0  ;;  %v547_v12 = vmax.f32 %v347_v9, 0.0  ;;  %v320_v15 = vld [vmem:[#allocation2 + $0x3f0] sm:$0xff]  ;;  %643 = vmatprep.subr.mxu0 %v570_v4  ;;  %756 = vmatprep.subr.mxu1 %v572_v5  ;;  %v546_v17 = vmax.f32 %v346_v14, 0.0  ;;  %v322_v19 = vld [vmem:[#allocation2 + $0x400] sm:$0xff]  ;;  %v319_v20 = vld [vmem:[#allocation2 + $0x3e8] sm:$0xff] }
  0x21   : > { %v520_v18 = vmax.f32 %v320_v15, 0.0  ;;  %v321_v21 = vld [vmem:[#allocation2 + $0x3f8] sm:$0xff]  ;;  %644 = vmatpush1.msra.mxu0 %v569_v6  ;;  %757 = vmatpush1.msra.mxu1 %v571_v10  ;;  %v522_v22 = vmax.f32 %v322_v19, 0.0  ;;  %v519_v23 = vmax.f32 %v319_v20, 0.0  ;;  %v295_v25 = vld [vmem:[#allocation2 + $0x328] sm:$0xff]  ;;  %v294_v27 = vld [vmem:[#allocation2 + $0x320] sm:$0xff] }
  0x22   : > { %v521_v24 = vmax.f32 %v321_v21, 0.0  ;;  %v297_v26 = vld [vmem:[#allocation2 + $0x338] sm:$0xff]  ;;  %645 = vmatprep.subr.mxu0 %v545_v11  ;;  %758 = vmatprep.subr.mxu1 %v547_v12  ;;  %v495_v28 = vmax.f32 %v295_v25, 0.0  ;;  %v296_v30 = vld [vmem:[#allocation2 + $0x330] sm:$0xff]  ;;  %v270_v31 = vld [vmem:[#allocation2 + $0x260] sm:$0xff]  ;;  %v494_v33 = vmax.f32 %v294_v27, 0.0 }
  0x23   : > { %v497_v29 = vmax.f32 %v297_v26, 0.0  ;;  %v272_v32 = vld [vmem:[#allocation2 + $0x270] sm:$0xff]  ;;  %646 = vmatpush1.msra.mxu0 %v544_v16  ;;  %759 = vmatpush1.msra.mxu1 %v546_v17  ;;  %v496_v34 = vmax.f32 %v296_v30, 0.0  ;;  %v269_v35 = vld [vmem:[#allocation2 + $0x258] sm:$0xff]  ;;  %v271_v36 = vld [vmem:[#allocation2 + $0x268] sm:$0xff]  ;;  %s3333_s23 = smov (!%p2733_p1, %s2396_s23), 31 }
  0x24   : > { %v245_v37 = vld [vmem:[#allocation2 + $0x198] sm:$0xff]  ;;  %647 = vmatprep.subr.mxu0 %v520_v18  ;;  %760 = vmatprep.subr.mxu1 %v522_v22  ;;  %v470_v38 = vmax.f32 %v270_v31, 0.0  ;;  %v472_v39 = vmax.f32 %v272_v32, 0.0  ;;  %v247_v40 = vld [vmem:[#allocation2 + $0x1a8] sm:$0xff]  ;;  %v244_v41 = vld [vmem:[#allocation2 + $0x190] sm:$0xff]  ;;  %v469_v43 = vmax.f32 %v269_v35, 0.0 }
  0x25   : > { %v246_v42 = vld [vmem:[#allocation2 + $0x1a0] sm:$0xff]  ;;  %648 = vmatpush1.msra.mxu0 %v519_v23  ;;  %761 = vmatpush1.msra.mxu1 %v521_v24  ;;  %v471_v44 = vmax.f32 %v271_v36, 0.0  ;;  %v220_v45 = vld [vmem:[#allocation2 + $0xd0] sm:$0xff]  ;;  %v445_v47 = vmax.f32 %v245_v37, 0.0  ;;  %v447_v48 = vmax.f32 %v247_v40, 0.0  ;;  %v219_v49 = vld [vmem:[#allocation2 + $0xc8] sm:$0xff] }
  0x26   : > { %v222_v46 = vld [vmem:[#allocation2 + $0xe0] sm:$0xff]  ;;  %649 = vmatprep.subr.mxu0 %v495_v28  ;;  %762 = vmatprep.subr.mxu1 %v497_v29  ;;  %v221_v50 = vld [vmem:[#allocation2 + $0xd8] sm:$0xff]  ;;  %v444_v51 = vmax.f32 %v244_v41, 0.0  ;;  %v446_v52 = vmax.f32 %v246_v42, 0.0  ;;  %v195_v53 = vld [vmem:[#allocation2 + $0x8] sm:$0xff]  ;;  %s2397_s25 = sshll.u32 %s3333_s23, 3 }
  0x27   : > { %650 = vmatpush1.msra.mxu0 %v494_v33  ;;  %763 = vmatpush1.msra.mxu1 %v496_v34  ;;  %v197_v54 = vld [vmem:[#allocation2 + $0x18] sm:$0xff]  ;;  %v420_v55 = vmax.f32 %v220_v45, 0.0  ;;  %v422_v56 = vmax.f32 %v222_v46, 0.0  ;;  %v194_v57 = vld [vmem:[#allocation2] sm:$0xff]  ;;  %v196_v58 = vld [vmem:[#allocation2 + $0x10] sm:$0xff]  ;;  %v419_v59 = vmax.f32 %v219_v49, 0.0  ;;  %s2747_s28 = scalar_lea.vmem %s3323_s1, %s2397_s25 }
  0x28   : > { %651 = vmatprep.subr.mxu0 %v470_v38  ;;  %764 = vmatprep.subr.mxu1 %v472_v39  ;;  %v421_v60 = vmax.f32 %v221_v50, 0.0  ;;  %v395_v61 = vmax.f32 %v195_v53, 0.0  ;;  %v397_v62 = vmax.f32 %v197_v54, 0.0  ;;  %v374_v63 = vld [vmem:[#allocation2 + $0x5a0] sm:$0xff]  ;;  %v376_v1 = vld [vmem:[#allocation2 + $0x5b0] sm:$0xff]  ;;  %v394_v2 = vmax.f32 %v194_v57, 0.0 }
  0x29   : > { %652 = vmatpush1.msra.mxu0 %v469_v43  ;;  %765 = vmatpush1.msra.mxu1 %v471_v44  ;;  %v396_v3 = vmax.f32 %v196_v58, 0.0  ;;  %v373_v4 = vld [vmem:[#allocation2 + $0x598] sm:$0xff]  ;;  %v375_v5 = vld [vmem:[#allocation2 + $0x5a8] sm:$0xff]  ;;  %v2750_v6 = vld [vmem:[%s2747_s28] sm:$0xff]  ;;  %vm602_vm0 = vcmask 523264   ;;  %v574_v7 = vmax.f32 %v374_v63, 0.0 }
  0x2a   : > { %653 = vmatprep.subr.mxu0 %v445_v47  ;;  %766 = vmatprep.subr.mxu1 %v447_v48  ;;  %v576_v8 = vmax.f32 %v376_v1, 0.0  ;;  %v573_v9 = vmax.f32 %v373_v4, 0.0  ;;  %v575_v10 = vmax.f32 %v375_v5, 0.0  ;;  %v349_v11 = vld [vmem:[#allocation2 + $0x4d8] sm:$0xff]  ;;  %v351_v12 = vld [vmem:[#allocation2 + $0x4e8] sm:$0xff]  ;;  %v348_v13 = vld [vmem:[#allocation2 + $0x4d0] sm:$0xff] }
  0x2b   : > { %654 = vmatpush1.msra.mxu0 %v444_v51  ;;  %767 = vmatpush1.msra.mxu1 %v446_v52  ;;  %v350_v14 = vld [vmem:[#allocation2 + $0x4e0] sm:$0xff]  ;;  %v2757_v15 = vld [vmem:[%s2747_s28 + $0x8] sm:$0xff]  ;;  %v549_v16 = vmax.f32 %v349_v11, 0.0  ;;  %v551_v17 = vmax.f32 %v351_v12, 0.0  ;;  %v548_v18 = vmax.f32 %v348_v13, 0.0  ;;  %v324_v20 = vld [vmem:[#allocation2 + $0x410] sm:$0xff] }
  0x2c   : > { %655 = vmatprep.subr.mxu0 %v420_v55  ;;  %768 = vmatprep.subr.mxu1 %v422_v56  ;;  %v550_v19 = vmax.f32 %v350_v14, 0.0  ;;  %v326_v21 = vld [vmem:[#allocation2 + $0x420] sm:$0xff]  ;;  %v323_v22 = vld [vmem:[#allocation2 + $0x408] sm:$0xff]  ;;  %v325_v23 = vld [vmem:[#allocation2 + $0x418] sm:$0xff]  ;;  %v524_v25 = vmax.f32 %v324_v20, 0.0  ;;  %s2566_s29 = smul.u32 200, %s3333_s23 }
  0x2d   : > { %656 = vmatpush1.msra.mxu0 %v419_v59  ;;  %769 = vmatpush1.msra.mxu1 %v421_v60  ;;  %v2766_v24 = vld [vmem:[%s2747_s28 + $0x10] sm:$0xff]  ;;  %v526_v26 = vmax.f32 %v326_v21, 0.0  ;;  %v523_v27 = vmax.f32 %v323_v22, 0.0  ;;  %v525_v28 = vmax.f32 %v325_v23, 0.0  ;;  %v299_v29 = vld [vmem:[#allocation2 + $0x348] sm:$0xff]  ;;  %v301_v30 = vld [vmem:[#allocation2 + $0x358] sm:$0xff] }
  0x2e   : > { %657 = vmatprep.subr.mxu0 %v395_v61  ;;  %770 = vmatprep.subr.mxu1 %v397_v62  ;;  %v298_v31 = vld [vmem:[#allocation2 + $0x340] sm:$0xff]  ;;  %v300_v32 = vld [vmem:[#allocation2 + $0x350] sm:$0xff]  ;;  %v2775_v33 = vld [vmem:[%s2747_s28 + $0x18] sm:$0xff]  ;;  %v499_v34 = vmax.f32 %v299_v29, 0.0  ;;  %v501_v35 = vmax.f32 %v301_v30, 0.0  ;;  %s3087_s4 = scalar_lea.vmem %s3324_s2, %s2566_s29 }
  0x2f   : > { %658 = vmatpush1.msra.mxu0 %v394_v2  ;;  %771 = vmatpush1.msra.mxu1 %v396_v3  ;;  %v498_v36 = vmax.f32 %v298_v31, 0.0  ;;  %v500_v37 = vmax.f32 %v300_v32, 0.0  ;;  %v274_v38 = vld [vmem:[#allocation2 + $0x280] sm:$0xff]  ;;  %v276_v39 = vld [vmem:[#allocation2 + $0x290] sm:$0xff]  ;;  %v273_v40 = vld [vmem:[#allocation2 + $0x278] sm:$0xff] }
  0x30   : > { %2400 = vmatmul.mubr.msk.f32.vlgmr.msra.gmra.mxu0 %vm602_vm0, %v2750_v6  ;;  %2408 = vmatmul.mubr.msk.f32.vlgmr.msra.gmra.mxu1 %vm602_vm0, %v2750_v6  ;;  %v275_v41 = vld [vmem:[#allocation2 + $0x288] sm:$0xff]  ;;  %v2784_v42 = vld [vmem:[%s2747_s28 + $0x20] sm:$0xff]  ;;  %v474_v43 = vmax.f32 %v274_v38, 0.0  ;;  %v476_v44 = vmax.f32 %v276_v39, 0.0  ;;  %v473_v45 = vmax.f32 %v273_v40, 0.0  ;;  %v249_v47 = vld [vmem:[#allocation2 + $0x1b8] sm:$0xff] }
  0x31   : > { %869 = vmatprep.subr.mxu0 %v574_v7  ;;  %982 = vmatprep.subr.mxu1 %v576_v8  ;;  %v475_v46 = vmax.f32 %v275_v41, 0.0  ;;  %v251_v48 = vld [vmem:[#allocation2 + $0x1c8] sm:$0xff]  ;;  %v248_v49 = vld [vmem:[#allocation2 + $0x1b0] sm:$0xff]  ;;  %v250_v50 = vld [vmem:[#allocation2 + $0x1c0] sm:$0xff]  ;;  %v449_v52 = vmax.f32 %v249_v47, 0.0 }
  0x32   : > { %870 = vmatpush1.msra.mxu0 %v573_v9  ;;  %983 = vmatpush1.msra.mxu1 %v575_v10  ;;  %v2793_v51 = vld [vmem:[%s2747_s28 + $0x28] sm:$0xff]  ;;  %v451_v53 = vmax.f32 %v251_v48, 0.0  ;;  %v448_v54 = vmax.f32 %v248_v49, 0.0  ;;  %v450_v55 = vmax.f32 %v250_v50, 0.0  ;;  %v224_v56 = vld [vmem:[#allocation2 + $0xf0] sm:$0xff]  ;;  %v226_v57 = vld [vmem:[#allocation2 + $0x100] sm:$0xff] }
  0x33   : > { %697 = vmatprep.mubr.f32.mxu0 %v2670_v0  ;;  %810 = vmatprep.mubr.f32.mxu1 %v2670_v0  ;;  %v223_v58 = vld [vmem:[#allocation2 + $0xe8] sm:$0xff]  ;;  %v225_v59 = vld [vmem:[#allocation2 + $0xf8] sm:$0xff]  ;;  %v2802_v60 = vld [vmem:[%s2747_s28 + $0x30] sm:$0xff]  ;;  %v424_v61 = vmax.f32 %v224_v56, 0.0  ;;  %v426_v62 = vmax.f32 %v226_v57, 0.0 }
  0x34   : > { %2401 = vmatmul.mubr.msk.f32.gmra.mxu0 %vm602_vm0, %v2757_v15  ;;  %2409 = vmatmul.mubr.msk.f32.gmra.mxu1 %vm602_vm0, %v2757_v15  ;;  %v423_v63 = vmax.f32 %v223_v58, 0.0  ;;  %v425_v1 = vmax.f32 %v225_v59, 0.0  ;;  %v199_v2 = vld [vmem:[#allocation2 + $0x28] sm:$0xff]  ;;  %v201_v3 = vld [vmem:[#allocation2 + $0x38] sm:$0xff]  ;;  %v198_v4 = vld [vmem:[#allocation2 + $0x20] sm:$0xff] }
  0x35   : > { %871 = vmatprep.subr.mxu0 %v549_v16  ;;  %984 = vmatprep.subr.mxu1 %v551_v17  ;;  %v200_v5 = vld [vmem:[#allocation2 + $0x30] sm:$0xff]  ;;  %v2811_v7 = vld [vmem:[%s2747_s28 + $0x38] sm:$0xff]  ;;  %v399_v8 = vmax.f32 %v199_v2, 0.0  ;;  %v401_v9 = vmax.f32 %v201_v3, 0.0  ;;  %v398_v10 = vmax.f32 %v198_v4, 0.0  ;;  %v378_v12 = vld [vmem:[#allocation2 + $0x5c0] sm:$0xff] }
  0x36   : > { %872 = vmatpush1.msra.mxu0 %v548_v18  ;;  %985 = vmatpush1.msra.mxu1 %v550_v19  ;;  %v400_v11 = vmax.f32 %v200_v5, 0.0  ;;  %v380_v13 = vld [vmem:[#allocation2 + $0x5d0] sm:$0xff]  ;;  %v377_v14 = vld [vmem:[#allocation2 + $0x5b8] sm:$0xff]  ;;  %v379_v16 = vld [vmem:[#allocation2 + $0x5c8] sm:$0xff]  ;;  %v578_v17 = vmax.f32 %v378_v12, 0.0 }
  0x37   : > { %703 = vmatprep.mubr.f32.mxu0 %v2670_v0  ;;  %816 = vmatprep.mubr.f32.mxu1 %v2670_v0  ;;  %v580_v18 = vmax.f32 %v380_v13, 0.0  ;;  %v577_v19 = vmax.f32 %v377_v14, 0.0  ;;  %v579_v20 = vmax.f32 %v379_v16, 0.0  ;;  %v353_v21 = vld [vmem:[#allocation2 + $0x4f8] sm:$0xff]  ;;  %v355_v22 = vld [vmem:[#allocation2 + $0x508] sm:$0xff]  ;;  %v352_v23 = vld [vmem:[#allocation2 + $0x4f0] sm:$0xff] }
  0x38   : > { %2402 = vmatmul.mubr.msk.f32.gmra.mxu0 %vm602_vm0, %v2766_v24  ;;  %2410 = vmatmul.mubr.msk.f32.gmra.mxu1 %vm602_vm0, %v2766_v24  ;;  %v328_v30 = vld [vmem:[#allocation2 + $0x430] sm:$0xff]  ;;  %v330_v31 = vld [vmem:[#allocation2 + $0x440] sm:$0xff]  ;;  %v327_v32 = vld [vmem:[#allocation2 + $0x428] sm:$0xff] }
  0x39   : > { %873 = vmatprep.subr.mxu0 %v524_v25  ;;  %986 = vmatprep.subr.mxu1 %v526_v26  ;;  %v354_v25 = vld [vmem:[#allocation2 + $0x500] sm:$0xff]  ;;  %v553_v26 = vmax.f32 %v353_v21, 0.0  ;;  %v303_v39 = vld [vmem:[#allocation2 + $0x368] sm:$0xff]  ;;  %v305_v40 = vld [vmem:[#allocation2 + $0x378] sm:$0xff] }
  0x3a   : > { %874 = vmatpush1.msra.mxu0 %v523_v27  ;;  %987 = vmatpush1.msra.mxu1 %v525_v28  ;;  %v555_v27 = vmax.f32 %v355_v22, 0.0  ;;  %v552_v28 = vmax.f32 %v352_v23, 0.0  ;;  %v554_v29 = vmax.f32 %v354_v25, 0.0  ;;  %v302_v41 = vld [vmem:[#allocation2 + $0x360] sm:$0xff]  ;;  %v280_v49 = vld [vmem:[#allocation2 + $0x2b0] sm:$0xff]  ;;  %v277_v50 = vld [vmem:[#allocation2 + $0x298] sm:$0xff] }
  0x3b   : > { %709 = vmatprep.mubr.f32.mxu0 %v2670_v0  ;;  %822 = vmatprep.mubr.f32.mxu1 %v2670_v0  ;;  %v278_v48 = vld [vmem:[#allocation2 + $0x2a0] sm:$0xff]  ;;  %v253_v57 = vld [vmem:[#allocation2 + $0x1d8] sm:$0xff]  ;;  %v255_v58 = vld [vmem:[#allocation2 + $0x1e8] sm:$0xff] }
  0x3c   : > { %2403 = vmatmul.mubr.msk.f32.gmra.mxu0 %vm602_vm0, %v2775_v33  ;;  %2411 = vmatmul.mubr.msk.f32.gmra.mxu1 %vm602_vm0, %v2775_v33  ;;  %v252_v59 = vld [vmem:[#allocation2 + $0x1d0] sm:$0xff]  ;;  %v230_v4 = vld [vmem:[#allocation2 + $0x120] sm:$0xff]  ;;  %v227_v5 = vld [vmem:[#allocation2 + $0x108] sm:$0xff] }
  0x3d   : > { %875 = vmatprep.subr.mxu0 %v499_v34  ;;  %988 = vmatprep.subr.mxu1 %v501_v35  ;;  %v329_v34 = vld [vmem:[#allocation2 + $0x438] sm:$0xff]  ;;  %v528_v35 = vmax.f32 %v328_v30, 0.0  ;;  %v228_v3 = vld [vmem:[#allocation2 + $0x110] sm:$0xff]  ;;  %v203_v13 = vld [vmem:[#allocation2 + $0x48] sm:$0xff] }
  0x3e   : > { %876 = vmatpush1.msra.mxu0 %v498_v36  ;;  %989 = vmatpush1.msra.mxu1 %v500_v37  ;;  %v530_v36 = vmax.f32 %v330_v31, 0.0  ;;  %v527_v37 = vmax.f32 %v327_v32, 0.0  ;;  %v529_v38 = vmax.f32 %v329_v34, 0.0  ;;  %v205_v14 = vld [vmem:[#allocation2 + $0x58] sm:$0xff]  ;;  %v202_v16 = vld [vmem:[#allocation2 + $0x40] sm:$0xff]  ;;  %v384_v23 = vld [vmem:[#allocation2 + $0x5f0] sm:$0xff] }
  0x3f   : > { %715 = vmatprep.mubr.f32.mxu0 %v2670_v0  ;;  %828 = vmatprep.mubr.f32.mxu1 %v2670_v0  ;;  %v382_v22 = vld [vmem:[#allocation2 + $0x5e0] sm:$0xff]  ;;  %v381_v25 = vld [vmem:[#allocation2 + $0x5d8] sm:$0xff]  ;;  %v359_v32 = vld [vmem:[#allocation2 + $0x528] sm:$0xff] }
  0x40   : > { %2404 = vmatmul.mubr.msk.f32.gmra.mxu0 %vm602_vm0, %v2784_v42  ;;  %2412 = vmatmul.mubr.msk.f32.gmra.mxu1 %vm602_vm0, %v2784_v42  ;;  %v357_v31 = vld [vmem:[#allocation2 + $0x518] sm:$0xff]  ;;  %v356_v34 = vld [vmem:[#allocation2 + $0x510] sm:$0xff] }
  0x41   : > { %877 = vmatprep.subr.mxu0 %v474_v43  ;;  %990 = vmatprep.subr.mxu1 %v476_v44  ;;  %v304_v43 = vld [vmem:[#allocation2 + $0x370] sm:$0xff]  ;;  %v503_v44 = vmax.f32 %v303_v39, 0.0 }
  0x42   : > { %878 = vmatpush1.msra.mxu0 %v473_v45  ;;  %991 = vmatpush1.msra.mxu1 %v475_v46  ;;  %v505_v45 = vmax.f32 %v305_v40, 0.0  ;;  %v502_v46 = vmax.f32 %v302_v41, 0.0  ;;  %v504_v47 = vmax.f32 %v304_v43, 0.0  ;;  %v332_v40 = vld [vmem:[#allocation2 + $0x450] sm:$0xff]  ;;  %v334_v41 = vld [vmem:[#allocation2 + $0x460] sm:$0xff]  ;;  %v331_v43 = vld [vmem:[#allocation2 + $0x448] sm:$0xff] }
  0x43   : > { %721 = vmatprep.mubr.f32.mxu0 %v2670_v0  ;;  %834 = vmatprep.mubr.f32.mxu1 %v2670_v0 }
  0x44   : > { %2405 = vmatmul.mubr.msk.f32.gmra.mxu0 %vm602_vm0, %v2793_v51  ;;  %2413 = vmatmul.mubr.msk.f32.gmra.mxu1 %vm602_vm0, %v2793_v51 }
  0x45   : > { %879 = vmatprep.subr.mxu0 %v449_v52  ;;  %992 = vmatprep.subr.mxu1 %v451_v53  ;;  %v279_v52 = vld [vmem:[#allocation2 + $0x2a8] sm:$0xff]  ;;  %v478_v53 = vmax.f32 %v278_v48, 0.0 }
  0x46   : > { %880 = vmatpush1.msra.mxu0 %v448_v54  ;;  %993 = vmatpush1.msra.mxu1 %v450_v55  ;;  %v480_v54 = vmax.f32 %v280_v49, 0.0  ;;  %v477_v55 = vmax.f32 %v277_v50, 0.0  ;;  %v479_v56 = vmax.f32 %v279_v52, 0.0  ;;  %v307_v49 = vld [vmem:[#allocation2 + $0x388] sm:$0xff]  ;;  %v309_v50 = vld [vmem:[#allocation2 + $0x398] sm:$0xff]  ;;  %v306_v52 = vld [vmem:[#allocation2 + $0x380] sm:$0xff] }
  0x47   : > { %727 = vmatprep.mubr.f32.mxu0 %v2670_v0  ;;  %840 = vmatprep.mubr.f32.mxu1 %v2670_v0 }
  0x48   : > { %2406 = vmatmul.mubr.msk.f32.gmra.mxu0 %vm602_vm0, %v2802_v60  ;;  %2414 = vmatmul.mubr.msk.f32.gmra.mxu1 %vm602_vm0, %v2802_v60 }
  0x49   : > { %881 = vmatprep.subr.mxu0 %v424_v61  ;;  %994 = vmatprep.subr.mxu1 %v426_v62  ;;  %v254_v61 = vld [vmem:[#allocation2 + $0x1e0] sm:$0xff]  ;;  %v453_v62 = vmax.f32 %v253_v57, 0.0 }
  0x4a   : > { %882 = vmatpush1.msra.mxu0 %v423_v63  ;;  %995 = vmatpush1.msra.mxu1 %v425_v1  ;;  %v455_v63 = vmax.f32 %v255_v58, 0.0  ;;  %v452_v1 = vmax.f32 %v252_v59, 0.0  ;;  %v454_v2 = vmax.f32 %v254_v61, 0.0  ;;  %v282_v58 = vld [vmem:[#allocation2 + $0x2c0] sm:$0xff]  ;;  %v284_v59 = vld [vmem:[#allocation2 + $0x2d0] sm:$0xff]  ;;  %v281_v61 = vld [vmem:[#allocation2 + $0x2b8] sm:$0xff] }
  0x4b   : > { %733 = vmatprep.mubr.f32.mxu0 %v2670_v0  ;;  %846 = vmatprep.mubr.f32.mxu1 %v2670_v0 }
  0x4c   : > { %2407 = vmatmul.mubr.msk.f32.gmra.mxu0 %vm602_vm0, %v2811_v7  ;;  %2415 = vmatmul.mubr.msk.f32.gmra.mxu1 %vm602_vm0, %v2811_v7 }
  0x4d   : > { %883 = vmatprep.subr.mxu0 %v399_v8  ;;  %996 = vmatprep.subr.mxu1 %v401_v9  ;;  %v229_v8 = vld [vmem:[#allocation2 + $0x118] sm:$0xff]  ;;  %v428_v9 = vmax.f32 %v228_v3, 0.0 }
  0x4e   : > { %884 = vmatpush1.msra.mxu0 %v398_v10  ;;  %997 = vmatpush1.msra.mxu1 %v400_v11  ;;  %v430_v10 = vmax.f32 %v230_v4, 0.0  ;;  %v427_v11 = vmax.f32 %v227_v5, 0.0  ;;  %v429_v12 = vmax.f32 %v229_v8, 0.0  ;;  %v257_v4 = vld [vmem:[#allocation2 + $0x1f8] sm:$0xff]  ;;  %v259_v5 = vld [vmem:[#allocation2 + $0x208] sm:$0xff]  ;;  %v256_v8 = vld [vmem:[#allocation2 + $0x1f0] sm:$0xff] }
  0x4f   : > { %917 = vmatprep.mubr.f32.mxu0 %v2670_v0  ;;  %1030 = vmatprep.mubr.f32.mxu1 %v2670_v0 }
  0x50   : > { %2416 = vmatmul.mubr.msk.f32.vlgmr.msra.gmra.mxu0 %vm602_vm0, %v2750_v6  ;;  %2424 = vmatmul.mubr.msk.f32.vlgmr.msra.gmra.mxu1 %vm602_vm0, %v2750_v6 }
  0x51   : > { %1095 = vmatprep.subr.mxu0 %v578_v17  ;;  %1208 = vmatprep.subr.mxu1 %v580_v18  ;;  %v204_v17 = vld [vmem:[#allocation2 + $0x50] sm:$0xff]  ;;  %v403_v18 = vmax.f32 %v203_v13, 0.0 }
  0x52   : > { %1096 = vmatpush1.msra.mxu0 %v577_v19  ;;  %1209 = vmatpush1.msra.mxu1 %v579_v20  ;;  %v405_v19 = vmax.f32 %v205_v14, 0.0  ;;  %v402_v20 = vmax.f32 %v202_v16, 0.0  ;;  %v404_v21 = vmax.f32 %v204_v17, 0.0  ;;  %v232_v14 = vld [vmem:[#allocation2 + $0x130] sm:$0xff]  ;;  %v234_v16 = vld [vmem:[#allocation2 + $0x140] sm:$0xff]  ;;  %v231_v17 = vld [vmem:[#allocation2 + $0x128] sm:$0xff] }
  0x53   : > { %923 = vmatprep.mubr.f32.mxu0 %v2670_v0  ;;  %1036 = vmatprep.mubr.f32.mxu1 %v2670_v0 }
  0x54   : > { %2417 = vmatmul.mubr.msk.f32.gmra.mxu0 %vm602_vm0, %v2757_v15  ;;  %2425 = vmatmul.mubr.msk.f32.gmra.mxu1 %vm602_vm0, %v2757_v15 }
  0x55   : > { %1097 = vmatprep.subr.mxu0 %v553_v26  ;;  %1210 = vmatprep.subr.mxu1 %v555_v27  ;;  %v383_v26 = vld [vmem:[#allocation2 + $0x5e8] sm:$0xff]  ;;  %v582_v27 = vmax.f32 %v382_v22, 0.0 }
  0x56   : > { %1098 = vmatpush1.msra.mxu0 %v552_v28  ;;  %1211 = vmatpush1.msra.mxu1 %v554_v29  ;;  %v584_v28 = vmax.f32 %v384_v23, 0.0  ;;  %v581_v29 = vmax.f32 %v381_v25, 0.0  ;;  %v583_v30 = vmax.f32 %v383_v26, 0.0  ;;  %v207_v23 = vld [vmem:[#allocation2 + $0x68] sm:$0xff]  ;;  %v209_v25 = vld [vmem:[#allocation2 + $0x78] sm:$0xff]  ;;  %v206_v26 = vld [vmem:[#allocation2 + $0x60] sm:$0xff] }
  0x57   : > { %929 = vmatprep.mubr.f32.mxu0 %v2670_v0  ;;  %1042 = vmatprep.mubr.f32.mxu1 %v2670_v0 }
  0x58   : > { %2418 = vmatmul.mubr.msk.f32.gmra.mxu0 %vm602_vm0, %v2766_v24  ;;  %2426 = vmatmul.mubr.msk.f32.gmra.mxu1 %vm602_vm0, %v2766_v24 }
  0x59   : > { %1099 = vmatprep.subr.mxu0 %v528_v35  ;;  %1212 = vmatprep.subr.mxu1 %v530_v36  ;;  %v358_v35 = vld [vmem:[#allocation2 + $0x520] sm:$0xff]  ;;  %v557_v36 = vmax.f32 %v357_v31, 0.0 }
  0x5a   : > { %1100 = vmatpush1.msra.mxu0 %v527_v37  ;;  %1213 = vmatpush1.msra.mxu1 %v529_v38  ;;  %v559_v37 = vmax.f32 %v359_v32, 0.0  ;;  %v556_v38 = vmax.f32 %v356_v34, 0.0  ;;  %v558_v39 = vmax.f32 %v358_v35, 0.0  ;;  %v386_v32 = vld [vmem:[#allocation2 + $0x600] sm:$0xff]  ;;  %v388_v34 = vld [vmem:[#allocation2 + $0x610] sm:$0xff]  ;;  %v385_v35 = vld [vmem:[#allocation2 + $0x5f8] sm:$0xff] }
  0x5b   : > { %935 = vmatprep.mubr.f32.mxu0 %v2670_v0  ;;  %1048 = vmatprep.mubr.f32.mxu1 %v2670_v0 }
  0x5c   : > { %2419 = vmatmul.mubr.msk.f32.gmra.mxu0 %vm602_vm0, %v2775_v33  ;;  %2427 = vmatmul.mubr.msk.f32.gmra.mxu1 %vm602_vm0, %v2775_v33 }
  0x5d   : > { %1101 = vmatprep.subr.mxu0 %v503_v44  ;;  %1214 = vmatprep.subr.mxu1 %v505_v45  ;;  %v333_v44 = vld [vmem:[#allocation2 + $0x458] sm:$0xff]  ;;  %v532_v45 = vmax.f32 %v332_v40, 0.0 }
  0x5e   : > { %1102 = vmatpush1.msra.mxu0 %v502_v46  ;;  %1215 = vmatpush1.msra.mxu1 %v504_v47  ;;  %v534_v46 = vmax.f32 %v334_v41, 0.0  ;;  %v531_v47 = vmax.f32 %v331_v43, 0.0  ;;  %v533_v48 = vmax.f32 %v333_v44, 0.0  ;;  %v361_v41 = vld [vmem:[#allocation2 + $0x538] sm:$0xff]  ;;  %v363_v43 = vld [vmem:[#allocation2 + $0x548] sm:$0xff]  ;;  %v360_v44 = vld [vmem:[#allocation2 + $0x530] sm:$0xff] }
  0x5f   : > { %941 = vmatprep.mubr.f32.mxu0 %v2670_v0  ;;  %1054 = vmatprep.mubr.f32.mxu1 %v2670_v0 }
  0x60   : > { %2420 = vmatmul.mubr.msk.f32.gmra.mxu0 %vm602_vm0, %v2784_v42  ;;  %2428 = vmatmul.mubr.msk.f32.gmra.mxu1 %vm602_vm0, %v2784_v42 }
  0x61   : > { %1103 = vmatprep.subr.mxu0 %v478_v53  ;;  %1216 = vmatprep.subr.mxu1 %v480_v54  ;;  %v308_v53 = vld [vmem:[#allocation2 + $0x390] sm:$0xff]  ;;  %v507_v54 = vmax.f32 %v307_v49, 0.0 }
  0x62   : > { %1104 = vmatpush1.msra.mxu0 %v477_v55  ;;  %1217 = vmatpush1.msra.mxu1 %v479_v56  ;;  %v509_v55 = vmax.f32 %v309_v50, 0.0  ;;  %v506_v56 = vmax.f32 %v306_v52, 0.0  ;;  %v508_v57 = vmax.f32 %v308_v53, 0.0  ;;  %v336_v50 = vld [vmem:[#allocation2 + $0x470] sm:$0xff]  ;;  %v338_v52 = vld [vmem:[#allocation2 + $0x480] sm:$0xff]  ;;  %v335_v53 = vld [vmem:[#allocation2 + $0x468] sm:$0xff] }
  0x63   : > { %947 = vmatprep.mubr.f32.mxu0 %v2670_v0  ;;  %1060 = vmatprep.mubr.f32.mxu1 %v2670_v0 }
  0x64   : > { %2421 = vmatmul.mubr.msk.f32.gmra.mxu0 %vm602_vm0, %v2793_v51  ;;  %2429 = vmatmul.mubr.msk.f32.gmra.mxu1 %vm602_vm0, %v2793_v51 }
  0x65   : > { %1105 = vmatprep.subr.mxu0 %v453_v62  ;;  %1218 = vmatprep.subr.mxu1 %v455_v63  ;;  %v283_v62 = vld [vmem:[#allocation2 + $0x2c8] sm:$0xff]  ;;  %v482_v63 = vmax.f32 %v282_v58, 0.0 }
  0x66   : > { %1106 = vmatpush1.msra.mxu0 %v452_v1  ;;  %1219 = vmatpush1.msra.mxu1 %v454_v2  ;;  %v484_v1 = vmax.f32 %v284_v59, 0.0  ;;  %v481_v2 = vmax.f32 %v281_v61, 0.0  ;;  %v483_v3 = vmax.f32 %v283_v62, 0.0  ;;  %v311_v58 = vld [vmem:[#allocation2 + $0x3a8] sm:$0xff]  ;;  %v313_v59 = vld [vmem:[#allocation2 + $0x3b8] sm:$0xff]  ;;  %v310_v61 = vld [vmem:[#allocation2 + $0x3a0] sm:$0xff] }
  0x67   : > { %953 = vmatprep.mubr.f32.mxu0 %v2670_v0  ;;  %1066 = vmatprep.mubr.f32.mxu1 %v2670_v0  ;;  %v312_v62 = vld [vmem:[#allocation2 + $0x3b0] sm:$0xff] }
  0x68   : > { %2422 = vmatmul.mubr.msk.f32.gmra.mxu0 %vm602_vm0, %v2802_v60  ;;  %2430 = vmatmul.mubr.msk.f32.gmra.mxu1 %vm602_vm0, %v2802_v60 }
  0x69   : > { %1107 = vmatprep.subr.mxu0 %v428_v9  ;;  %1220 = vmatprep.subr.mxu1 %v430_v10  ;;  %v258_v9 = vld [vmem:[#allocation2 + $0x200] sm:$0xff]  ;;  %v457_v10 = vmax.f32 %v257_v4, 0.0  ;;  %v288_v4 = vld [vmem:[#allocation2 + $0x2f0] sm:$0xff] }
  0x6a   : > { %1108 = vmatpush1.msra.mxu0 %v427_v11  ;;  %1221 = vmatpush1.msra.mxu1 %v429_v12  ;;  %v459_v11 = vmax.f32 %v259_v5, 0.0  ;;  %v456_v12 = vmax.f32 %v256_v8, 0.0  ;;  %v458_v13 = vmax.f32 %v258_v9, 0.0  ;;  %v285_v5 = vld [vmem:[#allocation2 + $0x2d8] sm:$0xff]  ;;  %v287_v8 = vld [vmem:[#allocation2 + $0x2e8] sm:$0xff]  ;;  %v488_v9 = vmax.f32 %v288_v4, 0.0 }
  0x6b   : > { %959 = vmatprep.mubr.f32.mxu0 %v2670_v0  ;;  %1072 = vmatprep.mubr.f32.mxu1 %v2670_v0 }
  0x6c   : > { %2423 = vmatmul.mubr.msk.f32.gmra.mxu0 %vm602_vm0, %v2811_v7  ;;  %2431 = vmatmul.mubr.msk.f32.gmra.mxu1 %vm602_vm0, %v2811_v7 }
  0x6d   : > { %1109 = vmatprep.subr.mxu0 %v403_v18  ;;  %1222 = vmatprep.subr.mxu1 %v405_v19  ;;  %v233_v18 = vld [vmem:[#allocation2 + $0x138] sm:$0xff]  ;;  %v432_v19 = vmax.f32 %v232_v14, 0.0  ;;  %v260_v14 = vld [vmem:[#allocation2 + $0x210] sm:$0xff] }
  0x6e   : > { %1110 = vmatpush1.msra.mxu0 %v402_v20  ;;  %1223 = vmatpush1.msra.mxu1 %v404_v21  ;;  %v434_v20 = vmax.f32 %v234_v16, 0.0  ;;  %v431_v21 = vmax.f32 %v231_v17, 0.0  ;;  %v433_v22 = vmax.f32 %v233_v18, 0.0  ;;  %v262_v16 = vld [vmem:[#allocation2 + $0x220] sm:$0xff]  ;;  %v460_v18 = vmax.f32 %v260_v14, 0.0 }
  0x6f   : > { %1143 = vmatprep.mubr.f32.mxu0 %v2670_v0  ;;  %1256 = vmatprep.mubr.f32.mxu1 %v2670_v0 }
  0x70   : > { %2432 = vmatmul.mubr.msk.f32.vlgmr.msra.gmra.mxu0 %vm602_vm0, %v2750_v6  ;;  %2440 = vmatmul.mubr.msk.f32.vlgmr.msra.gmra.mxu1 %vm602_vm0, %v2750_v6 }
  0x71   : > { %1321 = vmatprep.subr.mxu0 %v582_v27  ;;  %1434 = vmatprep.subr.mxu1 %v584_v28  ;;  %v208_v27 = vld [vmem:[#allocation2 + $0x70] sm:$0xff]  ;;  %v407_v28 = vmax.f32 %v207_v23, 0.0  ;;  %v237_v23 = vld [vmem:[#allocation2 + $0x158] sm:$0xff] }
  0x72   : > { %1322 = vmatpush1.msra.mxu0 %v581_v29  ;;  %1435 = vmatpush1.msra.mxu1 %v583_v30  ;;  %v409_v29 = vmax.f32 %v209_v25, 0.0  ;;  %v406_v30 = vmax.f32 %v206_v26, 0.0  ;;  %v408_v31 = vmax.f32 %v208_v27, 0.0  ;;  %v437_v27 = vmax.f32 %v237_v23, 0.0 }
  0x73   : > { %1149 = vmatprep.mubr.f32.mxu0 %v2670_v0  ;;  %1262 = vmatprep.mubr.f32.mxu1 %v2670_v0 }
  0x74   : > { %2433 = vmatmul.mubr.msk.f32.gmra.mxu0 %vm602_vm0, %v2757_v15  ;;  %2441 = vmatmul.mubr.msk.f32.gmra.mxu1 %vm602_vm0, %v2757_v15 }
  0x75   : > { %1323 = vmatprep.subr.mxu0 %v557_v36  ;;  %1436 = vmatprep.subr.mxu1 %v559_v37  ;;  %v387_v36 = vld [vmem:[#allocation2 + $0x608] sm:$0xff]  ;;  %v586_v37 = vmax.f32 %v386_v32, 0.0 }
  0x76   : > { %1324 = vmatpush1.msra.mxu0 %v556_v38  ;;  %1437 = vmatpush1.msra.mxu1 %v558_v39  ;;  %v588_v38 = vmax.f32 %v388_v34, 0.0  ;;  %v585_v39 = vmax.f32 %v385_v35, 0.0  ;;  %v587_v40 = vmax.f32 %v387_v36, 0.0  ;;  %v390_v36 = vld [vmem:[#allocation2 + $0x620] sm:$0xff] }
  0x77   : > { %1155 = vmatprep.mubr.f32.mxu0 %v2670_v0  ;;  %1268 = vmatprep.mubr.f32.mxu1 %v2670_v0 }
  0x78   : > { %2434 = vmatmul.mubr.msk.f32.gmra.mxu0 %vm602_vm0, %v2766_v24  ;;  %2442 = vmatmul.mubr.msk.f32.gmra.mxu1 %vm602_vm0, %v2766_v24 }
  0x79   : > { %1325 = vmatprep.subr.mxu0 %v532_v45  ;;  %1438 = vmatprep.subr.mxu1 %v534_v46  ;;  %v362_v45 = vld [vmem:[#allocation2 + $0x540] sm:$0xff]  ;;  %v561_v46 = vmax.f32 %v361_v41, 0.0 }
  0x7a   : > { %1326 = vmatpush1.msra.mxu0 %v531_v47  ;;  %1439 = vmatpush1.msra.mxu1 %v533_v48  ;;  %v563_v47 = vmax.f32 %v363_v43, 0.0  ;;  %v560_v48 = vmax.f32 %v360_v44, 0.0  ;;  %v562_v49 = vmax.f32 %v362_v45, 0.0  ;;  %v365_v44 = vld [vmem:[#allocation2 + $0x558] sm:$0xff]  ;;  %v367_v45 = vld [vmem:[#allocation2 + $0x568] sm:$0xff] }
  0x7b   : > { %1161 = vmatprep.mubr.f32.mxu0 %v2670_v0  ;;  %1274 = vmatprep.mubr.f32.mxu1 %v2670_v0 }
  0x7c   : > { %2435 = vmatmul.mubr.msk.f32.gmra.mxu0 %vm602_vm0, %v2775_v33  ;;  %2443 = vmatmul.mubr.msk.f32.gmra.mxu1 %vm602_vm0, %v2775_v33 }
  0x7d   : > { %1327 = vmatprep.subr.mxu0 %v507_v54  ;;  %1440 = vmatprep.subr.mxu1 %v509_v55  ;;  %v337_v54 = vld [vmem:[#allocation2 + $0x478] sm:$0xff]  ;;  %v538_v55 = vmax.f32 %v338_v52, 0.0 }
  0x7e   : > { %1328 = vmatpush1.msra.mxu0 %v506_v56  ;;  %1441 = vmatpush1.msra.mxu1 %v508_v57  ;;  %v535_v56 = vmax.f32 %v335_v53, 0.0  ;;  %v537_v57 = vmax.f32 %v337_v54, 0.0  ;;  %v340_v53 = vld [vmem:[#allocation2 + $0x490] sm:$0xff]  ;;  %v342_v54 = vld [vmem:[#allocation2 + $0x4a0] sm:$0xff] }
  0x7f   : > { %1167 = vmatprep.mubr.f32.mxu0 %v2670_v0  ;;  %1280 = vmatprep.mubr.f32.mxu1 %v2670_v0 }
  0x80   : > { %2436 = vmatmul.mubr.msk.f32.gmra.mxu0 %vm602_vm0, %v2784_v42  ;;  %2444 = vmatmul.mubr.msk.f32.gmra.mxu1 %vm602_vm0, %v2784_v42 }
  0x81   : > { %1329 = vmatprep.subr.mxu0 %v482_v63  ;;  %1442 = vmatprep.subr.mxu1 %v484_v1  ;;  %v513_v63 = vmax.f32 %v313_v59, 0.0  ;;  %v510_v1 = vmax.f32 %v310_v61, 0.0 }
  0x82   : > { %1330 = vmatpush1.msra.mxu0 %v481_v2  ;;  %1443 = vmatpush1.msra.mxu1 %v483_v3  ;;  %v512_v2 = vmax.f32 %v312_v62, 0.0  ;;  %v286_v3 = vld [vmem:[#allocation2 + $0x2e0] sm:$0xff]  ;;  %v315_v62 = vld [vmem:[#allocation2 + $0x3c8] sm:$0xff] }
  0x83   : > { %1173 = vmatprep.mubr.f32.mxu0 %v2670_v0  ;;  %1286 = vmatprep.mubr.f32.mxu1 %v2670_v0 }
  0x84   : > { %2437 = vmatmul.mubr.msk.f32.gmra.mxu0 %vm602_vm0, %v2793_v51  ;;  %2445 = vmatmul.mubr.msk.f32.gmra.mxu1 %vm602_vm0, %v2793_v51 }
  0x85   : > { %1331 = vmatprep.subr.mxu0 %v457_v10  ;;  %1444 = vmatprep.subr.mxu1 %v459_v11  ;;  %v485_v10 = vmax.f32 %v285_v5, 0.0  ;;  %v487_v11 = vmax.f32 %v287_v8, 0.0 }
  0x86   : > { %1332 = vmatpush1.msra.mxu0 %v456_v12  ;;  %1445 = vmatpush1.msra.mxu1 %v458_v13  ;;  %v261_v12 = vld [vmem:[#allocation2 + $0x218] sm:$0xff]  ;;  %v263_v13 = vld [vmem:[#allocation2 + $0x228] sm:$0xff] }
  0x87   : > { %1179 = vmatprep.mubr.f32.mxu0 %v2670_v0  ;;  %1292 = vmatprep.mubr.f32.mxu1 %v2670_v0  ;;  %v463_v17 = vmax.f32 %v263_v13, 0.0 }
  0x88   : > { %2438 = vmatmul.mubr.msk.f32.gmra.mxu0 %vm602_vm0, %v2802_v60  ;;  %2446 = vmatmul.mubr.msk.f32.gmra.mxu1 %vm602_vm0, %v2802_v60 }
  0x89   : > { %1333 = vmatprep.subr.mxu0 %v432_v19  ;;  %1446 = vmatprep.subr.mxu1 %v434_v20  ;;  %v462_v19 = vmax.f32 %v262_v16, 0.0  ;;  %v236_v20 = vld [vmem:[#allocation2 + $0x150] sm:$0xff] }
  0x8a   : > { %1334 = vmatpush1.msra.mxu0 %v431_v21  ;;  %1447 = vmatpush1.msra.mxu1 %v433_v22  ;;  %v238_v21 = vld [vmem:[#allocation2 + $0x160] sm:$0xff]  ;;  %v235_v22 = vld [vmem:[#allocation2 + $0x148] sm:$0xff] }
  0x8b   : > { %1185 = vmatprep.mubr.f32.mxu0 %v2670_v0  ;;  %1298 = vmatprep.mubr.f32.mxu1 %v2670_v0  ;;  %v438_v25 = vmax.f32 %v238_v21, 0.0  ;;  %v435_v26 = vmax.f32 %v235_v22, 0.0  ;;  %v3002_v21 = vld [vmem:[%s2747_s28 + $0x20] sm:$0xff] }
  0x8c   : > { %2439 = vmatmul.mubr.msk.f32.gmra.mxu0 %vm602_vm0, %v2811_v7  ;;  %2447 = vmatmul.mubr.msk.f32.gmra.mxu1 %vm602_vm0, %v2811_v7 }
  0x8d   : > { %1335 = vmatprep.subr.mxu0 %v407_v28  ;;  %1448 = vmatprep.subr.mxu1 %v409_v29  ;;  %v211_v28 = vld [vmem:[#allocation2 + $0x88] sm:$0xff]  ;;  %v213_v29 = vld [vmem:[#allocation2 + $0x98] sm:$0xff] }
  0x8e   : > { %1336 = vmatpush1.msra.mxu0 %v406_v30  ;;  %1449 = vmatpush1.msra.mxu1 %v408_v31  ;;  %v210_v30 = vld [vmem:[#allocation2 + $0x80] sm:$0xff]  ;;  %v212_v31 = vld [vmem:[#allocation2 + $0x90] sm:$0xff]  ;;  %v413_v32 = vmax.f32 %v213_v29, 0.0  ;;  %v241_v29 = vld [vmem:[#allocation2 + $0x178] sm:$0xff] }
  0x8f   : > { %1369 = vmatprep.mubr.f32.mxu0 %v2670_v0  ;;  %1482 = vmatprep.mubr.f32.mxu1 %v2670_v0  ;;  %v410_v34 = vmax.f32 %v210_v30, 0.0  ;;  %v412_v35 = vmax.f32 %v212_v31, 0.0  ;;  %v3011_v30 = vld [vmem:[%s2747_s28 + $0x28] sm:$0xff] }
  0x90   : > { %2448 = vmatmul.mubr.msk.f32.vlgmr.msra.gmra.mxu0 %vm602_vm0, %v2750_v6  ;;  %2456 = vmatmul.mubr.msk.f32.vlgmr.msra.gmra.mxu1 %vm602_vm0, %v2750_v6  ;;  %v536_v6 = vmax.f32 %v336_v50, 0.0 }
  0x91   : > { %1547 = vmatprep.subr.mxu0 %v586_v37  ;;  %1660 = vmatprep.subr.mxu1 %v588_v38  ;;  %v392_v37 = vld [vmem:[#allocation2 + $0x630] sm:$0xff]  ;;  %v389_v38 = vld [vmem:[#allocation2 + $0x618] sm:$0xff] }
  0x92   : > { %1548 = vmatpush1.msra.mxu0 %v585_v39  ;;  %1661 = vmatpush1.msra.mxu1 %v587_v40  ;;  %v391_v39 = vld [vmem:[#allocation2 + $0x628] sm:$0xff]  ;;  %v592_v40 = vmax.f32 %v392_v37, 0.0  ;;  %v589_v41 = vmax.f32 %v389_v38, 0.0  ;;  %v214_v37 = vld [vmem:[#allocation2 + $0xa0] sm:$0xff]  ;;  %v216_v38 = vld [vmem:[#allocation2 + $0xb0] sm:$0xff] }
  0x93   : > { %1375 = vmatprep.mubr.f32.mxu0 %v2670_v0  ;;  %1488 = vmatprep.mubr.f32.mxu1 %v2670_v0  ;;  %v591_v43 = vmax.f32 %v391_v39, 0.0  ;;  %v3020_v39 = vld [vmem:[%s2747_s28 + $0x30] sm:$0xff] }
  0x94   : > { %2449 = vmatmul.mubr.msk.f32.gmra.mxu0 %vm602_vm0, %v2757_v15  ;;  %2457 = vmatmul.mubr.msk.f32.gmra.mxu1 %vm602_vm0, %v2757_v15  ;;  %v511_v15 = vmax.f32 %v311_v58, 0.0  ;;  %v542_v58 = vmax.f32 %v342_v54, 0.0  ;;  %v293_v54 = vld [vmem:[#allocation2 + $0x318] sm:$0xff] }
  0x95   : > { %1549 = vmatprep.subr.mxu0 %v561_v46  ;;  %1662 = vmatprep.subr.mxu1 %v563_v47  ;;  %v364_v46 = vld [vmem:[#allocation2 + $0x550] sm:$0xff]  ;;  %v366_v47 = vld [vmem:[#allocation2 + $0x560] sm:$0xff] }
  0x96   : > { %1550 = vmatpush1.msra.mxu0 %v560_v48  ;;  %1663 = vmatpush1.msra.mxu1 %v562_v49  ;;  %v2966_v48 = vld [vmem:[%s2747_s28] sm:$0xff]  ;;  %v567_v49 = vmax.f32 %v367_v45, 0.0  ;;  %v564_v50 = vmax.f32 %v364_v46, 0.0  ;;  %v566_v52 = vmax.f32 %v366_v47, 0.0  ;;  %v3029_v45 = vld [vmem:[%s2747_s28 + $0x38] sm:$0xff]  ;;  %v368_v47 = vld [vmem:[#allocation2 + $0x570] sm:$0xff] }
  0x97   : > { %1381 = vmatprep.mubr.f32.mxu0 %v2670_v0  ;;  %1494 = vmatprep.mubr.f32.mxu1 %v2670_v0 }
  0x98   : > { %2450 = vmatmul.mubr.msk.f32.gmra.mxu0 %vm602_vm0, %v2766_v24  ;;  %2458 = vmatmul.mubr.msk.f32.gmra.mxu1 %vm602_vm0, %v2766_v24  ;;  %v486_v24 = vmax.f32 %v286_v3, 0.0  ;;  %v515_v3 = vmax.f32 %v315_v62, 0.0 }
  0x99   : > { %1551 = vmatprep.subr.mxu0 %v536_v6  ;;  %1664 = vmatprep.subr.mxu1 %v538_v55  ;;  %v339_v6 = vld [vmem:[#allocation2 + $0x488] sm:$0xff]  ;;  %v341_v55 = vld [vmem:[#allocation2 + $0x498] sm:$0xff] }
  0x9a   : > { %1552 = vmatpush1.msra.mxu0 %v535_v56  ;;  %1665 = vmatpush1.msra.mxu1 %v537_v57  ;;  %v2975_v56 = vld [vmem:[%s2747_s28 + $0x8] sm:$0xff]  ;;  %v540_v57 = vmax.f32 %v340_v53, 0.0  ;;  %v539_v59 = vmax.f32 %v339_v6, 0.0  ;;  %v541_v61 = vmax.f32 %v341_v55, 0.0  ;;  %v493_v6 = vmax.f32 %v293_v54, 0.0  ;;  %v268_v55 = vld [vmem:[#allocation2 + $0x250] sm:$0xff] }
  0x9b   : > { %1387 = vmatprep.mubr.f32.mxu0 %v2670_v0  ;;  %1500 = vmatprep.mubr.f32.mxu1 %v2670_v0 }
  0x9c   : > { %2451 = vmatmul.mubr.msk.f32.gmra.mxu0 %vm602_vm0, %v2775_v33  ;;  %2459 = vmatmul.mubr.msk.f32.gmra.mxu1 %vm602_vm0, %v2775_v33  ;;  %v461_v33 = vmax.f32 %v261_v12, 0.0  ;;  %v2993_v12 = vld [vmem:[%s2747_s28 + $0x18] sm:$0xff] }
  0x9d   : > { %1553 = vmatprep.subr.mxu0 %v511_v15  ;;  %1666 = vmatprep.subr.mxu1 %v513_v63  ;;  %v317_v15 = vld [vmem:[#allocation2 + $0x3d8] sm:$0xff]  ;;  %v314_v63 = vld [vmem:[#allocation2 + $0x3c0] sm:$0xff] }
  0x9e   : > { %1554 = vmatpush1.msra.mxu0 %v510_v1  ;;  %1667 = vmatpush1.msra.mxu1 %v512_v2  ;;  %v316_v1 = vld [vmem:[#allocation2 + $0x3d0] sm:$0xff]  ;;  %v517_v4 = vmax.f32 %v317_v15, 0.0  ;;  %v514_v5 = vmax.f32 %v314_v63, 0.0 }
  0x9f   : > { %1393 = vmatprep.mubr.f32.mxu0 %v2670_v0  ;;  %1506 = vmatprep.mubr.f32.mxu1 %v2670_v0  ;;  %v2984_v2 = vld [vmem:[%s2747_s28 + $0x10] sm:$0xff]  ;;  %v516_v8 = vmax.f32 %v316_v1, 0.0 }
  0xa0   : > { %2452 = vmatmul.mubr.msk.f32.gmra.mxu0 %vm602_vm0, %v2784_v42  ;;  %2460 = vmatmul.mubr.msk.f32.gmra.mxu1 %vm602_vm0, %v2784_v42  ;;  %v436_v42 = vmax.f32 %v236_v20, 0.0  ;;  %v266_v20 = vld [vmem:[#allocation2 + $0x240] sm:$0xff] }
  0xa1   : > { %1555 = vmatprep.subr.mxu0 %v486_v24  ;;  %1668 = vmatprep.subr.mxu1 %v488_v9  ;;  %v290_v24 = vld [vmem:[#allocation2 + $0x300] sm:$0xff]  ;;  %v292_v9 = vld [vmem:[#allocation2 + $0x310] sm:$0xff] }
  0xa2   : > { %1556 = vmatpush1.msra.mxu0 %v485_v10  ;;  %1669 = vmatpush1.msra.mxu1 %v487_v11  ;;  %v289_v10 = vld [vmem:[#allocation2 + $0x2f8] sm:$0xff]  ;;  %v291_v11 = vld [vmem:[#allocation2 + $0x308] sm:$0xff]  ;;  %v490_v13 = vmax.f32 %v290_v24, 0.0  ;;  %v492_v14 = vmax.f32 %v292_v9, 0.0 }
  0xa3   : > { %1399 = vmatprep.mubr.f32.mxu0 %v2670_v0  ;;  %1512 = vmatprep.mubr.f32.mxu1 %v2670_v0  ;;  %v489_v16 = vmax.f32 %v289_v10, 0.0 }
  0xa4   : > { %2453 = vmatmul.mubr.msk.f32.gmra.mxu0 %vm602_vm0, %v2793_v51  ;;  %2461 = vmatmul.mubr.msk.f32.gmra.mxu1 %vm602_vm0, %v2793_v51  ;;  %v411_v51 = vmax.f32 %v211_v28, 0.0  ;;  %v239_v28 = vld [vmem:[#allocation2 + $0x168] sm:$0xff] }
  0xa5   : > { %1557 = vmatprep.subr.mxu0 %v461_v33  ;;  %1670 = vmatprep.subr.mxu1 %v463_v17  ;;  %v491_v33 = vmax.f32 %v291_v11, 0.0  ;;  %v265_v17 = vld [vmem:[#allocation2 + $0x238] sm:$0xff] }
  0xa6   : > { %1558 = vmatpush1.msra.mxu0 %v460_v18  ;;  %1671 = vmatpush1.msra.mxu1 %v462_v19  ;;  %v267_v18 = vld [vmem:[#allocation2 + $0x248] sm:$0xff]  ;;  %v264_v19 = vld [vmem:[#allocation2 + $0x230] sm:$0xff]  ;;  %v465_v22 = vmax.f32 %v265_v17, 0.0 }
  0xa7   : > { %1405 = vmatprep.mubr.f32.mxu0 %v2670_v0  ;;  %1518 = vmatprep.mubr.f32.mxu1 %v2670_v0  ;;  %v467_v23 = vmax.f32 %v267_v18, 0.0 }
  0xa8   : > { %2454 = vmatmul.mubr.msk.f32.gmra.mxu0 %vm602_vm0, %v2802_v60  ;;  %2462 = vmatmul.mubr.msk.f32.gmra.mxu1 %vm602_vm0, %v2802_v60  ;;  %v590_v60 = vmax.f32 %v390_v36, 0.0  ;;  %v217_v36 = vld [vmem:[#allocation2 + $0xb8] sm:$0xff] }
  0xa9   : > { %1559 = vmatprep.subr.mxu0 %v436_v42  ;;  %1672 = vmatprep.subr.mxu1 %v438_v25  ;;  %v464_v42 = vmax.f32 %v264_v19, 0.0  ;;  %v466_v25 = vmax.f32 %v266_v20, 0.0 }
  0xaa   : > { %1560 = vmatpush1.msra.mxu0 %v435_v26  ;;  %1673 = vmatpush1.msra.mxu1 %v437_v27  ;;  %v240_v26 = vld [vmem:[#allocation2 + $0x170] sm:$0xff]  ;;  %v242_v27 = vld [vmem:[#allocation2 + $0x180] sm:$0xff] }
  0xab   : > { %1411 = vmatprep.mubr.f32.mxu0 %v2670_v0  ;;  %1524 = vmatprep.mubr.f32.mxu1 %v2670_v0  ;;  %v440_v31 = vmax.f32 %v240_v26, 0.0 }
  0xac   : > { %2455 = vmatmul.mubr.msk.f32.gmra.mxu0 %vm602_vm0, %v2811_v7  ;;  %2463 = vmatmul.mubr.msk.f32.gmra.mxu1 %vm602_vm0, %v2811_v7  ;;  %v565_v7 = vmax.f32 %v365_v44, 0.0  ;;  %v393_v44 = vld [vmem:[#allocation2 + $0x638] sm:$0xff] }
  0xad   : > { %1561 = vmatprep.subr.mxu0 %v411_v51  ;;  %1674 = vmatprep.subr.mxu1 %v413_v32  ;;  %v442_v51 = vmax.f32 %v242_v27, 0.0  ;;  %v439_v32 = vmax.f32 %v239_v28, 0.0  ;;  %v593_v46 = vmax.f32 %v393_v44, 0.0 }
  0xae   : > { %1562 = vmatpush1.msra.mxu0 %v410_v34  ;;  %1675 = vmatpush1.msra.mxu1 %v412_v35  ;;  %v441_v34 = vmax.f32 %v241_v29, 0.0  ;;  %v215_v35 = vld [vmem:[#allocation2 + $0xa8] sm:$0xff] }
  0xaf   : > { %1595 = vmatprep.mubr.f32.mxu0 %v2670_v0  ;;  %1708 = vmatprep.mubr.f32.mxu1 %v2670_v0 }
  0xb0   : > { %2464 = vmatmul.mubr.msk.f32.vlgmr.msra.gmra.mxu0 %vm602_vm0, %v2966_v48  ;;  %2472 = vmatmul.mubr.msk.f32.vlgmr.msra.gmra.mxu1 %vm602_vm0, %v2966_v48 }
  0xb1   : > { %1773 = vmatprep.subr.mxu0 %v590_v60  ;;  %1886 = vmatprep.subr.mxu1 %v592_v40  ;;  %v415_v60 = vmax.f32 %v215_v35, 0.0  ;;  %v417_v40 = vmax.f32 %v217_v36, 0.0 }
  0xb2   : > { %1774 = vmatpush1.msra.mxu0 %v589_v41  ;;  %1887 = vmatpush1.msra.mxu1 %v591_v43  ;;  %v414_v41 = vmax.f32 %v214_v37, 0.0  ;;  %v416_v43 = vmax.f32 %v216_v38, 0.0 }
  0xb3   : > { %1601 = vmatprep.mubr.f32.mxu0 %v2670_v0  ;;  %1714 = vmatprep.mubr.f32.mxu1 %v2670_v0 }
  0xb4   : > { %2465 = vmatmul.mubr.msk.f32.gmra.mxu0 %vm602_vm0, %v2975_v56  ;;  %2473 = vmatmul.mubr.msk.f32.gmra.mxu1 %vm602_vm0, %v2975_v56 }
  0xb5   : > { %1775 = vmatprep.subr.mxu0 %v565_v7  ;;  %1888 = vmatprep.subr.mxu1 %v567_v49  ;;  %v568_v7 = vmax.f32 %v368_v47, 0.0  ;;  %v343_v49 = vld [vmem:[#allocation2 + $0x4a8] sm:$0xff] }
  0xb6   : > { %1776 = vmatpush1.msra.mxu0 %v564_v50  ;;  %1889 = vmatpush1.msra.mxu1 %v566_v52  ;;  %v543_v50 = vmax.f32 %v343_v49, 0.0  ;;  %v318_v52 = vld [vmem:[#allocation2 + $0x3e0] sm:$0xff] }
  0xb7   : > { %1607 = vmatprep.mubr.f32.mxu0 %v2670_v0  ;;  %1720 = vmatprep.mubr.f32.mxu1 %v2670_v0  ;;  %v518_v53 = vmax.f32 %v318_v52, 0.0 }
  0xb8   : > { %2466 = vmatmul.mubr.msk.f32.gmra.mxu0 %vm602_vm0, %v2984_v2  ;;  %2474 = vmatmul.mubr.msk.f32.gmra.mxu1 %vm602_vm0, %v2984_v2 }
  0xb9   : > { %1777 = vmatprep.subr.mxu0 %v540_v57  ;;  %1890 = vmatprep.subr.mxu1 %v542_v58  ;;  %v468_v57 = vmax.f32 %v268_v55, 0.0  ;;  %v243_v58 = vld [vmem:[#allocation2 + $0x188] sm:$0xff] }
  0xba   : > { %1778 = vmatpush1.msra.mxu0 %v539_v59  ;;  %1891 = vmatpush1.msra.mxu1 %v541_v61  ;;  %v443_v59 = vmax.f32 %v243_v58, 0.0  ;;  %v218_v61 = vld [vmem:[#allocation2 + $0xc0] sm:$0xff] }
  0xbb   : > { %1613 = vmatprep.mubr.f32.mxu0 %v2670_v0  ;;  %1726 = vmatprep.mubr.f32.mxu1 %v2670_v0  ;;  %v418_v62 = vmax.f32 %v218_v61, 0.0 }
  0xbc   : > { %2467 = vmatmul.mubr.msk.f32.gmra.mxu0 %vm602_vm0, %v2993_v12  ;;  %2475 = vmatmul.mubr.msk.f32.gmra.mxu1 %vm602_vm0, %v2993_v12 }
  0xbd   : > { %1779 = vmatprep.subr.mxu0 %v515_v3  ;;  %1892 = vmatprep.subr.mxu1 %v517_v4 }
  0xbe   : > { %1780 = vmatpush1.msra.mxu0 %v514_v5  ;;  %1893 = vmatpush1.msra.mxu1 %v516_v8 }
  0xbf   : > { %1619 = vmatprep.mubr.f32.mxu0 %v2670_v0  ;;  %1732 = vmatprep.mubr.f32.mxu1 %v2670_v0 }
  0xc0   : > { %2468 = vmatmul.mubr.msk.f32.gmra.mxu0 %vm602_vm0, %v3002_v21  ;;  %2476 = vmatmul.mubr.msk.f32.gmra.mxu1 %vm602_vm0, %v3002_v21 }
  0xc1   : > { %1781 = vmatprep.subr.mxu0 %v490_v13  ;;  %1894 = vmatprep.subr.mxu1 %v492_v14 }
  0xc2   : > { %1782 = vmatpush1.msra.mxu0 %v489_v16  ;;  %1895 = vmatpush1.msra.mxu1 %v491_v33 }
  0xc3   : > { %1625 = vmatprep.mubr.f32.mxu0 %v2670_v0  ;;  %1738 = vmatprep.mubr.f32.mxu1 %v2670_v0 }
  0xc4   : > { %2469 = vmatmul.mubr.msk.f32.gmra.mxu0 %vm602_vm0, %v3011_v30  ;;  %2477 = vmatmul.mubr.msk.f32.gmra.mxu1 %vm602_vm0, %v3011_v30 }
  0xc5   : > { %1783 = vmatprep.subr.mxu0 %v465_v22  ;;  %1896 = vmatprep.subr.mxu1 %v467_v23 }
  0xc6   : > { %1784 = vmatpush1.msra.mxu0 %v464_v42  ;;  %1897 = vmatpush1.msra.mxu1 %v466_v25 }
  0xc7   : > { %1631 = vmatprep.mubr.f32.mxu0 %v2670_v0  ;;  %1744 = vmatprep.mubr.f32.mxu1 %v2670_v0 }
  0xc8   : > { %2470 = vmatmul.mubr.msk.f32.gmra.mxu0 %vm602_vm0, %v3020_v39  ;;  %2478 = vmatmul.mubr.msk.f32.gmra.mxu1 %vm602_vm0, %v3020_v39 }
  0xc9   : > { %1785 = vmatprep.subr.mxu0 %v440_v31  ;;  %1898 = vmatprep.subr.mxu1 %v442_v51 }
  0xca   : > { %1786 = vmatpush1.msra.mxu0 %v439_v32  ;;  %1899 = vmatpush1.msra.mxu1 %v441_v34 }
  0xcb   : > { %1637 = vmatprep.mubr.f32.mxu0 %v2670_v0  ;;  %1750 = vmatprep.mubr.f32.mxu1 %v2670_v0 }
  0xcc   : > { %2471 = vmatmul.mubr.msk.f32.gmra.mxu0 %vm602_vm0, %v3029_v45  ;;  %2479 = vmatmul.mubr.msk.f32.gmra.mxu1 %vm602_vm0, %v3029_v45 }
  0xcd   : > { %1787 = vmatprep.subr.mxu0 %v415_v60  ;;  %1900 = vmatprep.subr.mxu1 %v417_v40 }
  0xce   : > { %1788 = vmatpush1.msra.mxu0 %v414_v41  ;;  %1901 = vmatpush1.msra.mxu1 %v416_v43 }
  0xcf   : > { %1821 = vmatprep.mubr.f32.mxu0 %v2670_v0  ;;  %1934 = vmatprep.mubr.f32.mxu1 %v2670_v0 }
  0xd0   : > { %2480 = vmatmul.mubr.msk.f32.vlgmr.msra.gmra.mxu0 %vm602_vm0, %v2966_v48  ;;  %2488 = vmatmul.mubr.msk.f32.vlgmr.msra.gmra.mxu1 %vm602_vm0, %v2966_v48 }
  0xd1   : > { %2522 = vmatprep.subr.mxu0 %v593_v46  ;;  %2550 = vmatprep.subr.mxu1 %v593_v46 }
  0xd2   : > { %2523 = vmatpush3.msra.mxu0 %v593_v46  ;;  %2558 = vmatpush3.msra.mxu1 %v593_v46 }
  0xd3   : > { %1827 = vmatprep.mubr.f32.mxu0 %v2670_v0  ;;  %1940 = vmatprep.mubr.f32.mxu1 %v2670_v0 }
  0xd4   : > { %2481 = vmatmul.mubr.msk.f32.gmra.mxu0 %vm602_vm0, %v2975_v56  ;;  %2489 = vmatmul.mubr.msk.f32.gmra.mxu1 %vm602_vm0, %v2975_v56 }
  0xd5   : > { %2524 = vmatprep.subr.mxu0 %v568_v7  ;;  %2551 = vmatprep.subr.mxu1 %v568_v7 }
  0xd6   : > { %2525 = vmatpush3.msra.mxu0 %v568_v7  ;;  %2559 = vmatpush3.msra.mxu1 %v568_v7 }
  0xd7   : > { %1833 = vmatprep.mubr.f32.mxu0 %v2670_v0  ;;  %1946 = vmatprep.mubr.f32.mxu1 %v2670_v0 }
  0xd8   : > { %2482 = vmatmul.mubr.msk.f32.gmra.mxu0 %vm602_vm0, %v2984_v2  ;;  %2490 = vmatmul.mubr.msk.f32.gmra.mxu1 %vm602_vm0, %v2984_v2 }
  0xd9   : > { %2526 = vmatprep.subr.mxu0 %v543_v50  ;;  %2552 = vmatprep.subr.mxu1 %v543_v50 }
  0xda   : > { %2527 = vmatpush3.msra.mxu0 %v543_v50  ;;  %2560 = vmatpush3.msra.mxu1 %v543_v50 }
  0xdb   : > { %1839 = vmatprep.mubr.f32.mxu0 %v2670_v0  ;;  %1952 = vmatprep.mubr.f32.mxu1 %v2670_v0 }
  0xdc   : > { %2483 = vmatmul.mubr.msk.f32.gmra.mxu0 %vm602_vm0, %v2993_v12  ;;  %2491 = vmatmul.mubr.msk.f32.gmra.mxu1 %vm602_vm0, %v2993_v12 }
  0xdd   : > { %2528 = vmatprep.subr.mxu0 %v518_v53  ;;  %2553 = vmatprep.subr.mxu1 %v518_v53 }
  0xde   : > { %2529 = vmatpush3.msra.mxu0 %v518_v53  ;;  %2561 = vmatpush3.msra.mxu1 %v518_v53 }
  0xdf   : > { %1845 = vmatprep.mubr.f32.mxu0 %v2670_v0  ;;  %1958 = vmatprep.mubr.f32.mxu1 %v2670_v0 }
  0xe0   : > { %2484 = vmatmul.mubr.msk.f32.gmra.mxu0 %vm602_vm0, %v3002_v21  ;;  %2492 = vmatmul.mubr.msk.f32.gmra.mxu1 %vm602_vm0, %v3002_v21 }
  0xe1   : > { %2530 = vmatprep.subr.mxu0 %v493_v6  ;;  %2554 = vmatprep.subr.mxu1 %v493_v6 }
  0xe2   : > { %2531 = vmatpush3.msra.mxu0 %v493_v6  ;;  %2562 = vmatpush3.msra.mxu1 %v493_v6 }
  0xe3   : > { %1851 = vmatprep.mubr.f32.mxu0 %v2670_v0  ;;  %1964 = vmatprep.mubr.f32.mxu1 %v2670_v0 }
  0xe4   : > { %2485 = vmatmul.mubr.msk.f32.gmra.mxu0 %vm602_vm0, %v3011_v30  ;;  %2493 = vmatmul.mubr.msk.f32.gmra.mxu1 %vm602_vm0, %v3011_v30 }
  0xe5   : > { %2532 = vmatprep.subr.mxu0 %v468_v57  ;;  %2555 = vmatprep.subr.mxu1 %v468_v57 }
  0xe6   : > { %2533 = vmatpush3.msra.mxu0 %v468_v57  ;;  %2563 = vmatpush3.msra.mxu1 %v468_v57 }
  0xe7   : > { %1857 = vmatprep.mubr.f32.mxu0 %v2670_v0  ;;  %1970 = vmatprep.mubr.f32.mxu1 %v2670_v0 }
  0xe8   : > { %2486 = vmatmul.mubr.msk.f32.gmra.mxu0 %vm602_vm0, %v3020_v39  ;;  %2494 = vmatmul.mubr.msk.f32.gmra.mxu1 %vm602_vm0, %v3020_v39 }
  0xe9   : > { %2534 = vmatprep.subr.mxu0 %v443_v59  ;;  %2556 = vmatprep.subr.mxu1 %v443_v59 }
  0xea   : > { %2535 = vmatpush3.msra.mxu0 %v443_v59  ;;  %2564 = vmatpush3.msra.mxu1 %v443_v59 }
  0xeb   : > { %1863 = vmatprep.mubr.f32.mxu0 %v2670_v0  ;;  %1976 = vmatprep.mubr.f32.mxu1 %v2670_v0 }
  0xec   : > { %2487 = vmatmul.mubr.msk.f32.gmra.mxu0 %vm602_vm0, %v3029_v45  ;;  %2495 = vmatmul.mubr.msk.f32.gmra.mxu1 %vm602_vm0, %v3029_v45 }
  0xed   : > { %2536 = vmatprep.subr.mxu0 %v418_v62  ;;  %2557 = vmatprep.subr.mxu1 %v418_v62 }
  0xee   : > { %2537 = vmatpush3.msra.mxu0 %v418_v62  ;;  %2565 = vmatpush3.msra.mxu1 %v418_v62 }
  0xef   : > { %2538 = vmatprep.mubr.msk.f32.mxu0 %vm602_vm0, %v2966_v48  ;;  %2544 = vmatprep.mubr.msk.f32.mxu1 %vm602_vm0, %v3002_v21 }
  0xf0   : > { %v693_v0 = vpop.f32.mrf.mxu0  ;;  %v806_v15 = vpop.f32.mrf.mxu1  ;;  %2539 = vmatmul.mubr.msk.f32.vlgmr.msra.gmra.mxu0 %vm602_vm0, %v2975_v56  ;;  %2545 = vmatmul.mubr.msk.f32.vlgmr.msra.gmra.mxu1 %vm602_vm0, %v3011_v30 }
  0xf1   : > { %2088 = vst [vmem:[%s3087_s4] sm:$0xff] %v693_v0  ;;  %2090 = vst [vmem:[%s3087_s4 + $0x10] sm:$0xff] %v806_v15  ;;  %2541 = vmatprep.mubr.msk.f32.mxu0 %vm602_vm0, %v2984_v2  ;;  %2547 = vmatprep.mubr.msk.f32.mxu1 %vm602_vm0, %v3020_v39 }
  0xf2   : > { %v695_v48 = vpop.f32.mrf.mxu0  ;;  %v808_v63 = vpop.f32.mrf.mxu1 }
  0xf3   : > { %2089 = vst [vmem:[%s3087_s4 + $0x8] sm:$0xff] %v695_v48  ;;  %2091 = vst [vmem:[%s3087_s4 + $0x18] sm:$0xff] %v808_v63 }
  0xf4   : > { %v699_v56 = vpop.f32.mrf.mxu0  ;;  %v812_v1 = vpop.f32.mrf.mxu1  ;;  %2542 = vmatmul.mubr.msk.f32.gmra.mxu0 %vm602_vm0, %v2993_v12  ;;  %2548 = vmatmul.mubr.msk.f32.gmra.mxu1 %vm602_vm0, %v3029_v45 }
  0xf5   : > { %2113 = vst [vmem:[%s3087_s4 + $0xc8] sm:$0xff] %v699_v56  ;;  %2115 = vst [vmem:[%s3087_s4 + $0xd8] sm:$0xff] %v812_v1 }
  0xf6   : > { %v701_v2 = vpop.f32.mrf.mxu0  ;;  %v814_v3 = vpop.f32.mrf.mxu1 }
  0xf7   : > { %2114 = vst [vmem:[%s3087_s4 + $0xd0] sm:$0xff] %v701_v2  ;;  %2116 = vst [vmem:[%s3087_s4 + $0xe0] sm:$0xff] %v814_v3 }
  0xf8   : > { %v705_v4 = vpop.f32.mrf.mxu0  ;;  %v818_v5 = vpop.f32.mrf.mxu1 }
  0xf9   : > { %2138 = vst [vmem:[%s3087_s4 + $0x190] sm:$0xff] %v705_v4  ;;  %2140 = vst [vmem:[%s3087_s4 + $0x1a0] sm:$0xff] %v818_v5 }
  0xfa   : > { %v707_v8 = vpop.f32.mrf.mxu0  ;;  %v820_v24 = vpop.f32.mrf.mxu1 }
  0xfb   : > { %2139 = vst [vmem:[%s3087_s4 + $0x198] sm:$0xff] %v707_v8  ;;  %2141 = vst [vmem:[%s3087_s4 + $0x1a8] sm:$0xff] %v820_v24 }
  0xfc   : > { %v711_v9 = vpop.f32.mrf.mxu0  ;;  %v824_v10 = vpop.f32.mrf.mxu1 }
  0xfd   : > { %2163 = vst [vmem:[%s3087_s4 + $0x258] sm:$0xff] %v711_v9  ;;  %2165 = vst [vmem:[%s3087_s4 + $0x268] sm:$0xff] %v824_v10 }
  0xfe   : > { %v713_v11 = vpop.f32.mrf.mxu0  ;;  %v826_v12 = vpop.f32.mrf.mxu1 }
  0xff   : > { %2164 = vst [vmem:[%s3087_s4 + $0x260] sm:$0xff] %v713_v11  ;;  %2166 = vst [vmem:[%s3087_s4 + $0x270] sm:$0xff] %v826_v12 }
 0x100   : > { %v717_v13 = vpop.f32.mrf.mxu0  ;;  %v830_v14 = vpop.f32.mrf.mxu1 }
 0x101   : > { %2188 = vst [vmem:[%s3087_s4 + $0x320] sm:$0xff] %v717_v13  ;;  %2190 = vst [vmem:[%s3087_s4 + $0x330] sm:$0xff] %v830_v14 }
 0x102   : > { %v719_v16 = vpop.f32.mrf.mxu0  ;;  %v832_v33 = vpop.f32.mrf.mxu1 }
 0x103   : > { %2189 = vst [vmem:[%s3087_s4 + $0x328] sm:$0xff] %v719_v16  ;;  %2191 = vst [vmem:[%s3087_s4 + $0x338] sm:$0xff] %v832_v33 }
 0x104   : > { %v723_v17 = vpop.f32.mrf.mxu0  ;;  %v836_v18 = vpop.f32.mrf.mxu1 }
 0x105   : > { %2213 = vst [vmem:[%s3087_s4 + $0x3e8] sm:$0xff] %v723_v17  ;;  %2215 = vst [vmem:[%s3087_s4 + $0x3f8] sm:$0xff] %v836_v18 }
 0x106   : > { %v725_v19 = vpop.f32.mrf.mxu0  ;;  %v838_v20 = vpop.f32.mrf.mxu1 }
 0x107   : > { %2214 = vst [vmem:[%s3087_s4 + $0x3f0] sm:$0xff] %v725_v19  ;;  %2216 = vst [vmem:[%s3087_s4 + $0x400] sm:$0xff] %v838_v20 }
 0x108   : > { %v729_v21 = vpop.f32.mrf.mxu0  ;;  %v842_v22 = vpop.f32.mrf.mxu1 }
 0x109   : > { %2238 = vst [vmem:[%s3087_s4 + $0x4b0] sm:$0xff] %v729_v21  ;;  %2240 = vst [vmem:[%s3087_s4 + $0x4c0] sm:$0xff] %v842_v22 }
 0x10a   : > { %v731_v23 = vpop.f32.mrf.mxu0  ;;  %v844_v42 = vpop.f32.mrf.mxu1 }
 0x10b   : > { %2239 = vst [vmem:[%s3087_s4 + $0x4b8] sm:$0xff] %v731_v23  ;;  %2241 = vst [vmem:[%s3087_s4 + $0x4c8] sm:$0xff] %v844_v42 }
 0x10c   : > { %v735_v25 = vpop.f32.mrf.mxu0  ;;  %v848_v26 = vpop.f32.mrf.mxu1 }
 0x10d   : > { %2263 = vst [vmem:[%s3087_s4 + $0x578] sm:$0xff] %v735_v25  ;;  %2265 = vst [vmem:[%s3087_s4 + $0x588] sm:$0xff] %v848_v26 }
 0x10e   : > { %v737_v27 = vpop.f32.mrf.mxu0  ;;  %v850_v28 = vpop.f32.mrf.mxu1 }
 0x10f   : > { %2264 = vst [vmem:[%s3087_s4 + $0x580] sm:$0xff] %v737_v27  ;;  %2266 = vst [vmem:[%s3087_s4 + $0x590] sm:$0xff] %v850_v28 }
 0x110   : > { %v919_v29 = vpop.f32.mrf.mxu0  ;;  %v1032_v30 = vpop.f32.mrf.mxu1 }
 0x111   : > { %2092 = vst [vmem:[%s3087_s4 + $0x20] sm:$0xff] %v919_v29  ;;  %2094 = vst [vmem:[%s3087_s4 + $0x30] sm:$0xff] %v1032_v30 }
 0x112   : > { %v921_v31 = vpop.f32.mrf.mxu0  ;;  %v1034_v51 = vpop.f32.mrf.mxu1 }
 0x113   : > { %2093 = vst [vmem:[%s3087_s4 + $0x28] sm:$0xff] %v921_v31  ;;  %2095 = vst [vmem:[%s3087_s4 + $0x38] sm:$0xff] %v1034_v51 }
 0x114   : > { %v925_v32 = vpop.f32.mrf.mxu0  ;;  %v1038_v34 = vpop.f32.mrf.mxu1 }
 0x115   : > { %2117 = vst [vmem:[%s3087_s4 + $0xe8] sm:$0xff] %v925_v32  ;;  %2119 = vst [vmem:[%s3087_s4 + $0xf8] sm:$0xff] %v1038_v34 }
 0x116   : > { %v927_v35 = vpop.f32.mrf.mxu0  ;;  %v1040_v36 = vpop.f32.mrf.mxu1 }
 0x117   : > { %2118 = vst [vmem:[%s3087_s4 + $0xf0] sm:$0xff] %v927_v35  ;;  %2120 = vst [vmem:[%s3087_s4 + $0x100] sm:$0xff] %v1040_v36 }
 0x118   : > { %v931_v37 = vpop.f32.mrf.mxu0  ;;  %v1044_v38 = vpop.f32.mrf.mxu1 }
 0x119   : > { %2142 = vst [vmem:[%s3087_s4 + $0x1b0] sm:$0xff] %v931_v37  ;;  %2144 = vst [vmem:[%s3087_s4 + $0x1c0] sm:$0xff] %v1044_v38 }
 0x11a   : > { %v933_v39 = vpop.f32.mrf.mxu0  ;;  %v1046_v60 = vpop.f32.mrf.mxu1 }
 0x11b   : > { %2143 = vst [vmem:[%s3087_s4 + $0x1b8] sm:$0xff] %v933_v39  ;;  %2145 = vst [vmem:[%s3087_s4 + $0x1c8] sm:$0xff] %v1046_v60 }
 0x11c   : > { %v937_v40 = vpop.f32.mrf.mxu0  ;;  %v1050_v41 = vpop.f32.mrf.mxu1 }
 0x11d   : > { %2167 = vst [vmem:[%s3087_s4 + $0x278] sm:$0xff] %v937_v40  ;;  %2169 = vst [vmem:[%s3087_s4 + $0x288] sm:$0xff] %v1050_v41 }
 0x11e   : > { %v939_v43 = vpop.f32.mrf.mxu0  ;;  %v1052_v44 = vpop.f32.mrf.mxu1 }
 0x11f   : > { %2168 = vst [vmem:[%s3087_s4 + $0x280] sm:$0xff] %v939_v43  ;;  %2170 = vst [vmem:[%s3087_s4 + $0x290] sm:$0xff] %v1052_v44 }
 0x120   : > { %v943_v45 = vpop.f32.mrf.mxu0  ;;  %v1056_v46 = vpop.f32.mrf.mxu1 }
 0x121   : > { %2192 = vst [vmem:[%s3087_s4 + $0x340] sm:$0xff] %v943_v45  ;;  %2194 = vst [vmem:[%s3087_s4 + $0x350] sm:$0xff] %v1056_v46 }
 0x122   : > { %v945_v47 = vpop.f32.mrf.mxu0  ;;  %v1058_v7 = vpop.f32.mrf.mxu1 }
 0x123   : > { %2193 = vst [vmem:[%s3087_s4 + $0x348] sm:$0xff] %v945_v47  ;;  %2195 = vst [vmem:[%s3087_s4 + $0x358] sm:$0xff] %v1058_v7 }
 0x124   : > { %v949_v49 = vpop.f32.mrf.mxu0  ;;  %v1062_v50 = vpop.f32.mrf.mxu1 }
 0x125   : > { %2217 = vst [vmem:[%s3087_s4 + $0x408] sm:$0xff] %v949_v49  ;;  %2219 = vst [vmem:[%s3087_s4 + $0x418] sm:$0xff] %v1062_v50 }
 0x126   : > { %v951_v52 = vpop.f32.mrf.mxu0  ;;  %v1064_v53 = vpop.f32.mrf.mxu1 }
 0x127   : > { %2218 = vst [vmem:[%s3087_s4 + $0x410] sm:$0xff] %v951_v52  ;;  %2220 = vst [vmem:[%s3087_s4 + $0x420] sm:$0xff] %v1064_v53 }
 0x128   : > { %v955_v54 = vpop.f32.mrf.mxu0  ;;  %v1068_v6 = vpop.f32.mrf.mxu1 }
 0x129   : > { %2242 = vst [vmem:[%s3087_s4 + $0x4d0] sm:$0xff] %v955_v54  ;;  %2244 = vst [vmem:[%s3087_s4 + $0x4e0] sm:$0xff] %v1068_v6 }
 0x12a   : > { %v957_v55 = vpop.f32.mrf.mxu0  ;;  %v1070_v57 = vpop.f32.mrf.mxu1 }
 0x12b   : > { %2243 = vst [vmem:[%s3087_s4 + $0x4d8] sm:$0xff] %v957_v55  ;;  %2245 = vst [vmem:[%s3087_s4 + $0x4e8] sm:$0xff] %v1070_v57 }
 0x12c   : > { %v961_v58 = vpop.f32.mrf.mxu0  ;;  %v1074_v59 = vpop.f32.mrf.mxu1 }
 0x12d   : > { %2267 = vst [vmem:[%s3087_s4 + $0x598] sm:$0xff] %v961_v58  ;;  %2269 = vst [vmem:[%s3087_s4 + $0x5a8] sm:$0xff] %v1074_v59 }
 0x12e   : > { %v963_v61 = vpop.f32.mrf.mxu0  ;;  %v1076_v62 = vpop.f32.mrf.mxu1 }
 0x12f   : > { %2268 = vst [vmem:[%s3087_s4 + $0x5a0] sm:$0xff] %v963_v61  ;;  %2270 = vst [vmem:[%s3087_s4 + $0x5b0] sm:$0xff] %v1076_v62 }
 0x130   : > { %v1145_v0 = vpop.f32.mrf.mxu0  ;;  %v1258_v15 = vpop.f32.mrf.mxu1 }
 0x131   : > { %2096 = vst [vmem:[%s3087_s4 + $0x40] sm:$0xff] %v1145_v0  ;;  %2098 = vst [vmem:[%s3087_s4 + $0x50] sm:$0xff] %v1258_v15 }
 0x132   : > { %v1147_v48 = vpop.f32.mrf.mxu0  ;;  %v1260_v63 = vpop.f32.mrf.mxu1 }
 0x133   : > { %2097 = vst [vmem:[%s3087_s4 + $0x48] sm:$0xff] %v1147_v48  ;;  %2099 = vst [vmem:[%s3087_s4 + $0x58] sm:$0xff] %v1260_v63 }
 0x134   : > { %v1151_v56 = vpop.f32.mrf.mxu0  ;;  %v1264_v1 = vpop.f32.mrf.mxu1 }
 0x135   : > { %2121 = vst [vmem:[%s3087_s4 + $0x108] sm:$0xff] %v1151_v56  ;;  %2123 = vst [vmem:[%s3087_s4 + $0x118] sm:$0xff] %v1264_v1 }
 0x136   : > { %v1153_v2 = vpop.f32.mrf.mxu0  ;;  %v1266_v3 = vpop.f32.mrf.mxu1 }
 0x137   : > { %2122 = vst [vmem:[%s3087_s4 + $0x110] sm:$0xff] %v1153_v2  ;;  %2124 = vst [vmem:[%s3087_s4 + $0x120] sm:$0xff] %v1266_v3 }
 0x138   : > { %v1157_v4 = vpop.f32.mrf.mxu0  ;;  %v1270_v5 = vpop.f32.mrf.mxu1 }
 0x139   : > { %2146 = vst [vmem:[%s3087_s4 + $0x1d0] sm:$0xff] %v1157_v4  ;;  %2148 = vst [vmem:[%s3087_s4 + $0x1e0] sm:$0xff] %v1270_v5 }
 0x13a   : > { %v1159_v8 = vpop.f32.mrf.mxu0  ;;  %v1272_v24 = vpop.f32.mrf.mxu1 }
 0x13b   : > { %2147 = vst [vmem:[%s3087_s4 + $0x1d8] sm:$0xff] %v1159_v8  ;;  %2149 = vst [vmem:[%s3087_s4 + $0x1e8] sm:$0xff] %v1272_v24 }
 0x13c   : > { %v1163_v9 = vpop.f32.mrf.mxu0  ;;  %v1276_v10 = vpop.f32.mrf.mxu1 }
 0x13d   : > { %2171 = vst [vmem:[%s3087_s4 + $0x298] sm:$0xff] %v1163_v9  ;;  %2173 = vst [vmem:[%s3087_s4 + $0x2a8] sm:$0xff] %v1276_v10 }
 0x13e   : > { %v1165_v11 = vpop.f32.mrf.mxu0  ;;  %v1278_v12 = vpop.f32.mrf.mxu1 }
 0x13f   : > { %2172 = vst [vmem:[%s3087_s4 + $0x2a0] sm:$0xff] %v1165_v11  ;;  %2174 = vst [vmem:[%s3087_s4 + $0x2b0] sm:$0xff] %v1278_v12 }
 0x140   : > { %v1169_v13 = vpop.f32.mrf.mxu0  ;;  %v1282_v14 = vpop.f32.mrf.mxu1 }
 0x141   : > { %2196 = vst [vmem:[%s3087_s4 + $0x360] sm:$0xff] %v1169_v13  ;;  %2198 = vst [vmem:[%s3087_s4 + $0x370] sm:$0xff] %v1282_v14 }
 0x142   : > { %v1171_v16 = vpop.f32.mrf.mxu0  ;;  %v1284_v33 = vpop.f32.mrf.mxu1 }
 0x143   : > { %2197 = vst [vmem:[%s3087_s4 + $0x368] sm:$0xff] %v1171_v16  ;;  %2199 = vst [vmem:[%s3087_s4 + $0x378] sm:$0xff] %v1284_v33 }
 0x144   : > { %v1175_v17 = vpop.f32.mrf.mxu0  ;;  %v1288_v18 = vpop.f32.mrf.mxu1 }
 0x145   : > { %2221 = vst [vmem:[%s3087_s4 + $0x428] sm:$0xff] %v1175_v17  ;;  %2223 = vst [vmem:[%s3087_s4 + $0x438] sm:$0xff] %v1288_v18 }
 0x146   : > { %v1177_v19 = vpop.f32.mrf.mxu0  ;;  %v1290_v20 = vpop.f32.mrf.mxu1 }
 0x147   : > { %2222 = vst [vmem:[%s3087_s4 + $0x430] sm:$0xff] %v1177_v19  ;;  %2224 = vst [vmem:[%s3087_s4 + $0x440] sm:$0xff] %v1290_v20 }
 0x148   : > { %v1181_v21 = vpop.f32.mrf.mxu0  ;;  %v1294_v22 = vpop.f32.mrf.mxu1 }
 0x149   : > { %2246 = vst [vmem:[%s3087_s4 + $0x4f0] sm:$0xff] %v1181_v21  ;;  %2248 = vst [vmem:[%s3087_s4 + $0x500] sm:$0xff] %v1294_v22 }
 0x14a   : > { %v1183_v23 = vpop.f32.mrf.mxu0  ;;  %v1296_v42 = vpop.f32.mrf.mxu1 }
 0x14b   : > { %2247 = vst [vmem:[%s3087_s4 + $0x4f8] sm:$0xff] %v1183_v23  ;;  %2249 = vst [vmem:[%s3087_s4 + $0x508] sm:$0xff] %v1296_v42 }
 0x14c   : > { %v1187_v25 = vpop.f32.mrf.mxu0  ;;  %v1300_v26 = vpop.f32.mrf.mxu1 }
 0x14d   : > { %2271 = vst [vmem:[%s3087_s4 + $0x5b8] sm:$0xff] %v1187_v25  ;;  %2273 = vst [vmem:[%s3087_s4 + $0x5c8] sm:$0xff] %v1300_v26 }
 0x14e   : > { %v1189_v27 = vpop.f32.mrf.mxu0  ;;  %v1302_v28 = vpop.f32.mrf.mxu1 }
 0x14f   : > { %2272 = vst [vmem:[%s3087_s4 + $0x5c0] sm:$0xff] %v1189_v27  ;;  %2274 = vst [vmem:[%s3087_s4 + $0x5d0] sm:$0xff] %v1302_v28 }
 0x150   : > { %v1371_v29 = vpop.f32.mrf.mxu0  ;;  %v1484_v30 = vpop.f32.mrf.mxu1 }
 0x151   : > { %2100 = vst [vmem:[%s3087_s4 + $0x60] sm:$0xff] %v1371_v29  ;;  %2102 = vst [vmem:[%s3087_s4 + $0x70] sm:$0xff] %v1484_v30 }
 0x152   : > { %v1373_v31 = vpop.f32.mrf.mxu0  ;;  %v1486_v51 = vpop.f32.mrf.mxu1 }
 0x153   : > { %2101 = vst [vmem:[%s3087_s4 + $0x68] sm:$0xff] %v1373_v31  ;;  %2103 = vst [vmem:[%s3087_s4 + $0x78] sm:$0xff] %v1486_v51 }
 0x154   : > { %v1377_v32 = vpop.f32.mrf.mxu0  ;;  %v1490_v34 = vpop.f32.mrf.mxu1 }
 0x155   : > { %2125 = vst [vmem:[%s3087_s4 + $0x128] sm:$0xff] %v1377_v32  ;;  %2127 = vst [vmem:[%s3087_s4 + $0x138] sm:$0xff] %v1490_v34 }
 0x156   : > { %v1379_v35 = vpop.f32.mrf.mxu0  ;;  %v1492_v36 = vpop.f32.mrf.mxu1 }
 0x157   : > { %2126 = vst [vmem:[%s3087_s4 + $0x130] sm:$0xff] %v1379_v35  ;;  %2128 = vst [vmem:[%s3087_s4 + $0x140] sm:$0xff] %v1492_v36 }
 0x158   : > { %v1383_v37 = vpop.f32.mrf.mxu0  ;;  %v1496_v38 = vpop.f32.mrf.mxu1 }
 0x159   : > { %2150 = vst [vmem:[%s3087_s4 + $0x1f0] sm:$0xff] %v1383_v37  ;;  %2152 = vst [vmem:[%s3087_s4 + $0x200] sm:$0xff] %v1496_v38 }
 0x15a   : > { %v1385_v39 = vpop.f32.mrf.mxu0  ;;  %v1498_v60 = vpop.f32.mrf.mxu1 }
 0x15b   : > { %2151 = vst [vmem:[%s3087_s4 + $0x1f8] sm:$0xff] %v1385_v39  ;;  %2153 = vst [vmem:[%s3087_s4 + $0x208] sm:$0xff] %v1498_v60 }
 0x15c   : > { %v1389_v40 = vpop.f32.mrf.mxu0  ;;  %v1502_v41 = vpop.f32.mrf.mxu1 }
 0x15d   : > { %2175 = vst [vmem:[%s3087_s4 + $0x2b8] sm:$0xff] %v1389_v40  ;;  %2177 = vst [vmem:[%s3087_s4 + $0x2c8] sm:$0xff] %v1502_v41 }
 0x15e   : > { %v1391_v43 = vpop.f32.mrf.mxu0  ;;  %v1504_v44 = vpop.f32.mrf.mxu1 }
 0x15f   : > { %2176 = vst [vmem:[%s3087_s4 + $0x2c0] sm:$0xff] %v1391_v43  ;;  %2178 = vst [vmem:[%s3087_s4 + $0x2d0] sm:$0xff] %v1504_v44 }
 0x160   : > { %v1395_v45 = vpop.f32.mrf.mxu0  ;;  %v1508_v46 = vpop.f32.mrf.mxu1 }
 0x161   : > { %2200 = vst [vmem:[%s3087_s4 + $0x380] sm:$0xff] %v1395_v45  ;;  %2202 = vst [vmem:[%s3087_s4 + $0x390] sm:$0xff] %v1508_v46 }
 0x162   : > { %v1397_v47 = vpop.f32.mrf.mxu0  ;;  %v1510_v7 = vpop.f32.mrf.mxu1 }
 0x163   : > { %2201 = vst [vmem:[%s3087_s4 + $0x388] sm:$0xff] %v1397_v47  ;;  %2203 = vst [vmem:[%s3087_s4 + $0x398] sm:$0xff] %v1510_v7 }
 0x164   : > { %v1401_v49 = vpop.f32.mrf.mxu0  ;;  %v1514_v50 = vpop.f32.mrf.mxu1 }
 0x165   : > { %2225 = vst [vmem:[%s3087_s4 + $0x448] sm:$0xff] %v1401_v49  ;;  %2227 = vst [vmem:[%s3087_s4 + $0x458] sm:$0xff] %v1514_v50 }
 0x166   : > { %v1403_v52 = vpop.f32.mrf.mxu0  ;;  %v1516_v53 = vpop.f32.mrf.mxu1 }
 0x167   : > { %2226 = vst [vmem:[%s3087_s4 + $0x450] sm:$0xff] %v1403_v52  ;;  %2228 = vst [vmem:[%s3087_s4 + $0x460] sm:$0xff] %v1516_v53 }
 0x168   : > { %v1407_v54 = vpop.f32.mrf.mxu0  ;;  %v1520_v6 = vpop.f32.mrf.mxu1 }
 0x169   : > { %2250 = vst [vmem:[%s3087_s4 + $0x510] sm:$0xff] %v1407_v54  ;;  %2252 = vst [vmem:[%s3087_s4 + $0x520] sm:$0xff] %v1520_v6 }
 0x16a   : > { %v1409_v55 = vpop.f32.mrf.mxu0  ;;  %v1522_v57 = vpop.f32.mrf.mxu1 }
 0x16b   : > { %2251 = vst [vmem:[%s3087_s4 + $0x518] sm:$0xff] %v1409_v55  ;;  %2253 = vst [vmem:[%s3087_s4 + $0x528] sm:$0xff] %v1522_v57 }
 0x16c   : > { %v1413_v58 = vpop.f32.mrf.mxu0  ;;  %v1526_v59 = vpop.f32.mrf.mxu1 }
 0x16d   : > { %2275 = vst [vmem:[%s3087_s4 + $0x5d8] sm:$0xff] %v1413_v58  ;;  %2277 = vst [vmem:[%s3087_s4 + $0x5e8] sm:$0xff] %v1526_v59 }
 0x16e   : > { %v1415_v61 = vpop.f32.mrf.mxu0  ;;  %v1528_v62 = vpop.f32.mrf.mxu1 }
 0x16f   : > { %2276 = vst [vmem:[%s3087_s4 + $0x5e0] sm:$0xff] %v1415_v61  ;;  %2278 = vst [vmem:[%s3087_s4 + $0x5f0] sm:$0xff] %v1528_v62 }
 0x170   : > { %v1597_v0 = vpop.f32.mrf.mxu0  ;;  %v1710_v15 = vpop.f32.mrf.mxu1 }
 0x171   : > { %2104 = vst [vmem:[%s3087_s4 + $0x80] sm:$0xff] %v1597_v0  ;;  %2106 = vst [vmem:[%s3087_s4 + $0x90] sm:$0xff] %v1710_v15 }
 0x172   : > { %v1599_v48 = vpop.f32.mrf.mxu0  ;;  %v1712_v63 = vpop.f32.mrf.mxu1 }
 0x173   : > { %2105 = vst [vmem:[%s3087_s4 + $0x88] sm:$0xff] %v1599_v48  ;;  %2107 = vst [vmem:[%s3087_s4 + $0x98] sm:$0xff] %v1712_v63 }
 0x174   : > { %v1603_v56 = vpop.f32.mrf.mxu0  ;;  %v1716_v1 = vpop.f32.mrf.mxu1 }
 0x175   : > { %2129 = vst [vmem:[%s3087_s4 + $0x148] sm:$0xff] %v1603_v56  ;;  %2131 = vst [vmem:[%s3087_s4 + $0x158] sm:$0xff] %v1716_v1 }
 0x176   : > { %v1605_v2 = vpop.f32.mrf.mxu0  ;;  %v1718_v3 = vpop.f32.mrf.mxu1 }
 0x177   : > { %2130 = vst [vmem:[%s3087_s4 + $0x150] sm:$0xff] %v1605_v2  ;;  %2132 = vst [vmem:[%s3087_s4 + $0x160] sm:$0xff] %v1718_v3 }
 0x178   : > { %v1609_v4 = vpop.f32.mrf.mxu0  ;;  %v1722_v5 = vpop.f32.mrf.mxu1 }
 0x179   : > { %2154 = vst [vmem:[%s3087_s4 + $0x210] sm:$0xff] %v1609_v4  ;;  %2156 = vst [vmem:[%s3087_s4 + $0x220] sm:$0xff] %v1722_v5 }
 0x17a   : > { %v1611_v8 = vpop.f32.mrf.mxu0  ;;  %v1724_v24 = vpop.f32.mrf.mxu1 }
 0x17b   : > { %2155 = vst [vmem:[%s3087_s4 + $0x218] sm:$0xff] %v1611_v8  ;;  %2157 = vst [vmem:[%s3087_s4 + $0x228] sm:$0xff] %v1724_v24 }
 0x17c   : > { %v1615_v9 = vpop.f32.mrf.mxu0  ;;  %v1728_v10 = vpop.f32.mrf.mxu1 }
 0x17d   : > { %2179 = vst [vmem:[%s3087_s4 + $0x2d8] sm:$0xff] %v1615_v9  ;;  %2181 = vst [vmem:[%s3087_s4 + $0x2e8] sm:$0xff] %v1728_v10 }
 0x17e   : > { %v1617_v11 = vpop.f32.mrf.mxu0  ;;  %v1730_v12 = vpop.f32.mrf.mxu1 }
 0x17f   : > { %2180 = vst [vmem:[%s3087_s4 + $0x2e0] sm:$0xff] %v1617_v11  ;;  %2182 = vst [vmem:[%s3087_s4 + $0x2f0] sm:$0xff] %v1730_v12 }
 0x180   : > { %v1621_v13 = vpop.f32.mrf.mxu0  ;;  %v1734_v14 = vpop.f32.mrf.mxu1 }
 0x181   : > { %2204 = vst [vmem:[%s3087_s4 + $0x3a0] sm:$0xff] %v1621_v13  ;;  %2206 = vst [vmem:[%s3087_s4 + $0x3b0] sm:$0xff] %v1734_v14 }
 0x182   : > { %v1623_v16 = vpop.f32.mrf.mxu0  ;;  %v1736_v33 = vpop.f32.mrf.mxu1 }
 0x183   : > { %2205 = vst [vmem:[%s3087_s4 + $0x3a8] sm:$0xff] %v1623_v16  ;;  %2207 = vst [vmem:[%s3087_s4 + $0x3b8] sm:$0xff] %v1736_v33 }
 0x184   : > { %v1627_v17 = vpop.f32.mrf.mxu0  ;;  %v1740_v18 = vpop.f32.mrf.mxu1 }
 0x185   : > { %2229 = vst [vmem:[%s3087_s4 + $0x468] sm:$0xff] %v1627_v17  ;;  %2231 = vst [vmem:[%s3087_s4 + $0x478] sm:$0xff] %v1740_v18 }
 0x186   : > { %v1629_v19 = vpop.f32.mrf.mxu0  ;;  %v1742_v20 = vpop.f32.mrf.mxu1 }
 0x187   : > { %2230 = vst [vmem:[%s3087_s4 + $0x470] sm:$0xff] %v1629_v19  ;;  %2232 = vst [vmem:[%s3087_s4 + $0x480] sm:$0xff] %v1742_v20 }
 0x188   : > { %v1633_v21 = vpop.f32.mrf.mxu0  ;;  %v1746_v22 = vpop.f32.mrf.mxu1 }
 0x189   : > { %2254 = vst [vmem:[%s3087_s4 + $0x530] sm:$0xff] %v1633_v21  ;;  %2256 = vst [vmem:[%s3087_s4 + $0x540] sm:$0xff] %v1746_v22 }
 0x18a   : > { %v1635_v23 = vpop.f32.mrf.mxu0  ;;  %v1748_v42 = vpop.f32.mrf.mxu1 }
 0x18b   : > { %2255 = vst [vmem:[%s3087_s4 + $0x538] sm:$0xff] %v1635_v23  ;;  %2257 = vst [vmem:[%s3087_s4 + $0x548] sm:$0xff] %v1748_v42 }
 0x18c   : > { %v1639_v25 = vpop.f32.mrf.mxu0  ;;  %v1752_v26 = vpop.f32.mrf.mxu1 }
 0x18d   : > { %2279 = vst [vmem:[%s3087_s4 + $0x5f8] sm:$0xff] %v1639_v25  ;;  %2281 = vst [vmem:[%s3087_s4 + $0x608] sm:$0xff] %v1752_v26 }
 0x18e   : > { %v1641_v27 = vpop.f32.mrf.mxu0  ;;  %v1754_v28 = vpop.f32.mrf.mxu1 }
 0x18f   : > { %2280 = vst [vmem:[%s3087_s4 + $0x600] sm:$0xff] %v1641_v27  ;;  %2282 = vst [vmem:[%s3087_s4 + $0x610] sm:$0xff] %v1754_v28 }
 0x190   : > { %v1823_v29 = vpop.f32.mrf.mxu0  ;;  %v1936_v30 = vpop.f32.mrf.mxu1 }
 0x191   : > { %2108 = vst [vmem:[%s3087_s4 + $0xa0] sm:$0xff] %v1823_v29  ;;  %2110 = vst [vmem:[%s3087_s4 + $0xb0] sm:$0xff] %v1936_v30 }
 0x192   : > { %v1825_v31 = vpop.f32.mrf.mxu0  ;;  %v1938_v51 = vpop.f32.mrf.mxu1 }
 0x193   : > { %2109 = vst [vmem:[%s3087_s4 + $0xa8] sm:$0xff] %v1825_v31  ;;  %2111 = vst [vmem:[%s3087_s4 + $0xb8] sm:$0xff] %v1938_v51 }
 0x194   : > { %v1829_v32 = vpop.f32.mrf.mxu0  ;;  %v1942_v34 = vpop.f32.mrf.mxu1 }
 0x195   : > { %2133 = vst [vmem:[%s3087_s4 + $0x168] sm:$0xff] %v1829_v32  ;;  %2135 = vst [vmem:[%s3087_s4 + $0x178] sm:$0xff] %v1942_v34 }
 0x196   : > { %v1831_v35 = vpop.f32.mrf.mxu0  ;;  %v1944_v36 = vpop.f32.mrf.mxu1 }
 0x197   : > { %2134 = vst [vmem:[%s3087_s4 + $0x170] sm:$0xff] %v1831_v35  ;;  %2136 = vst [vmem:[%s3087_s4 + $0x180] sm:$0xff] %v1944_v36 }
 0x198   : > { %v1835_v37 = vpop.f32.mrf.mxu0  ;;  %v1948_v38 = vpop.f32.mrf.mxu1 }
 0x199   : > { %2158 = vst [vmem:[%s3087_s4 + $0x230] sm:$0xff] %v1835_v37  ;;  %2160 = vst [vmem:[%s3087_s4 + $0x240] sm:$0xff] %v1948_v38 }
 0x19a   : > { %v1837_v39 = vpop.f32.mrf.mxu0  ;;  %v1950_v60 = vpop.f32.mrf.mxu1 }
 0x19b   : > { %2159 = vst [vmem:[%s3087_s4 + $0x238] sm:$0xff] %v1837_v39  ;;  %2161 = vst [vmem:[%s3087_s4 + $0x248] sm:$0xff] %v1950_v60 }
 0x19c   : > { %v1841_v40 = vpop.f32.mrf.mxu0  ;;  %v1954_v41 = vpop.f32.mrf.mxu1 }
 0x19d   : > { %2183 = vst [vmem:[%s3087_s4 + $0x2f8] sm:$0xff] %v1841_v40  ;;  %2185 = vst [vmem:[%s3087_s4 + $0x308] sm:$0xff] %v1954_v41 }
 0x19e   : > { %v1843_v43 = vpop.f32.mrf.mxu0  ;;  %v1956_v44 = vpop.f32.mrf.mxu1 }
 0x19f   : > { %2184 = vst [vmem:[%s3087_s4 + $0x300] sm:$0xff] %v1843_v43  ;;  %2186 = vst [vmem:[%s3087_s4 + $0x310] sm:$0xff] %v1956_v44 }
 0x1a0   : > { %v1847_v45 = vpop.f32.mrf.mxu0  ;;  %v1960_v46 = vpop.f32.mrf.mxu1 }
 0x1a1   : > { %2208 = vst [vmem:[%s3087_s4 + $0x3c0] sm:$0xff] %v1847_v45  ;;  %2210 = vst [vmem:[%s3087_s4 + $0x3d0] sm:$0xff] %v1960_v46 }
 0x1a2   : > { %v1849_v47 = vpop.f32.mrf.mxu0  ;;  %v1962_v7 = vpop.f32.mrf.mxu1 }
 0x1a3   : > { %2209 = vst [vmem:[%s3087_s4 + $0x3c8] sm:$0xff] %v1849_v47  ;;  %2211 = vst [vmem:[%s3087_s4 + $0x3d8] sm:$0xff] %v1962_v7 }
 0x1a4   : > { %v1853_v49 = vpop.f32.mrf.mxu0  ;;  %v1966_v50 = vpop.f32.mrf.mxu1 }
 0x1a5   : > { %2233 = vst [vmem:[%s3087_s4 + $0x488] sm:$0xff] %v1853_v49  ;;  %2235 = vst [vmem:[%s3087_s4 + $0x498] sm:$0xff] %v1966_v50 }
 0x1a6   : > { %v1855_v52 = vpop.f32.mrf.mxu0  ;;  %v1968_v53 = vpop.f32.mrf.mxu1 }
 0x1a7   : > { %2234 = vst [vmem:[%s3087_s4 + $0x490] sm:$0xff] %v1855_v52  ;;  %2236 = vst [vmem:[%s3087_s4 + $0x4a0] sm:$0xff] %v1968_v53 }
 0x1a8   : > { %v1859_v54 = vpop.f32.mrf.mxu0  ;;  %v1972_v6 = vpop.f32.mrf.mxu1 }
 0x1a9   : > { %2258 = vst [vmem:[%s3087_s4 + $0x550] sm:$0xff] %v1859_v54  ;;  %2260 = vst [vmem:[%s3087_s4 + $0x560] sm:$0xff] %v1972_v6 }
 0x1aa   : > { %v1861_v55 = vpop.f32.mrf.mxu0  ;;  %v1974_v57 = vpop.f32.mrf.mxu1 }
 0x1ab   : > { %2259 = vst [vmem:[%s3087_s4 + $0x558] sm:$0xff] %v1861_v55  ;;  %2261 = vst [vmem:[%s3087_s4 + $0x568] sm:$0xff] %v1974_v57 }
 0x1ac   : > { %v1865_v58 = vpop.f32.mrf.mxu0  ;;  %v1978_v59 = vpop.f32.mrf.mxu1 }
 0x1ad   : > { %2283 = vst [vmem:[%s3087_s4 + $0x618] sm:$0xff] %v1865_v58  ;;  %2285 = vst [vmem:[%s3087_s4 + $0x628] sm:$0xff] %v1978_v59 }
 0x1ae   : > { %v1867_v61 = vpop.f32.mrf.mxu0  ;;  %v1980_v62 = vpop.f32.mrf.mxu1 }
 0x1af   : > { %2284 = vst [vmem:[%s3087_s4 + $0x620] sm:$0xff] %v1867_v61  ;;  %2286 = vst [vmem:[%s3087_s4 + $0x630] sm:$0xff] %v1980_v62 }
 0x1b0   : > { %v2540_v0 = vpop.f32.mrf.mxu0  ;;  %v2546_v15 = vpop.f32.mrf.mxu1 }
 0x1b1   : > { %2137 = vst.msk [vmem:[%s3087_s4 + $0x188] sm:$0xff] %vm602_vm0, %v2540_v0  ;;  %2237 = vst.msk [vmem:[%s3087_s4 + $0x4a8] sm:$0xff] %vm602_vm0, %v2546_v15 }
 0x1b2   : > { %v2049_v48 = vpop.f32.mrf.mxu0  ;;  %v2069_v63 = vpop.f32.mrf.mxu1 }
 0x1b3   : > { %2112 = vst.msk [vmem:[%s3087_s4 + $0xc0] sm:$0xff] %vm602_vm0, %v2049_v48  ;;  %2212 = vst.msk [vmem:[%s3087_s4 + $0x3e0] sm:$0xff] %vm602_vm0, %v2069_v63 }
 0x1b4   : > { %v2543_v56 = vpop.f32.mrf.mxu0  ;;  %v2549_v1 = vpop.f32.mrf.mxu1 }
 0x1b5   : > { %2187 = vst.msk [vmem:[%s3087_s4 + $0x318] sm:$0xff] %vm602_vm0, %v2543_v56  ;;  %2287 = vst.msk [vmem:[%s3087_s4 + $0x638] sm:$0xff] %vm602_vm0, %v2549_v1 }
 0x1b6   : > { %v2059_v2 = vpop.f32.mrf.mxu0  ;;  %v2079_v3 = vpop.f32.mrf.mxu1 }
 0x1b7   : > { %2162 = vst.msk [vmem:[%s3087_s4 + $0x250] sm:$0xff] %vm602_vm0, %v2059_v2  ;;  %2262 = vst.msk [vmem:[%s3087_s4 + $0x570] sm:$0xff] %vm602_vm0, %v2079_v3 }
 0x1b8 PF: > { %s13_s11 = sadd.s32 1, %s2665_s11   ;;  %s3328_s9 = smov %s2661_s10 }
 0x1b9   : > { %p10_p2 = scmp.ge.s32.totalorder %s13_s11, 6   ;;  %s3329_s10 = smov %s3331_s13 }
 0x1bb   :  { %12 = sbr.rel (!%p10_p2) target bundleno = 2 (0x2), region = 64 }
 0x1c0   :  { %2320 = vsyncpa [#allocation3], 1 }
 0x1c1   :  { %2322 = vsyncpa [#allocation3 + $0x1], 1 }

</bundles_post_ra>
